<compile_context>
chip_gen: v7x
topology: tpu7x:2x2x1
jax: 0.10.0
libtpu: 0.0.40
codegen_flags: <defaults>
</compile_context>

<pallas_src>
import numpy as np
import jax
import jax.numpy as jnp
from jax.experimental import pallas as pl
from jax.experimental.pallas import tpu as pltpu

OUT_DIM = 4      # Linear(H, 4)
OUT_PAD = 128    # lane-dense output width; wrapper slices [:, :OUT_DIM]


# -----------------------------------------------------------------------------
# Kernel factory.  All shapes/offsets are static (closure); the whole
# recurrence is one flat unrolled block operating on VMEM refs / vreg values.
#
#   x_ref    : (S*B, 1)           univariate input, time-major, batch padded
#   lstm_ref : (R, 4H)            packed slab: [w_ih0 | w_ih(1..L-1) | w_hh(0..L-1) | b(0..L-1)]
#                                 each segment starts at an 8-aligned row offset
#   lin_ref  : (R2, OUT_PAD)      packed slab: [w_lin (H rows) | b_lin (1 row)], zero-padded lanes
#   out_ref  : (S*B, OUT_PAD)
# PyTorch gate ordering (i, f, g, o) is preserved along the 4H axis.
# -----------------------------------------------------------------------------
def make_lstm_kernel(S, B, H, L, lstm_offs):
    o_ih0, o_ih, o_hh, o_b = lstm_offs

    def kernel(x_ref, lstm_ref, lin_ref, out_ref):
        # ---- static weight views (loaded once; tiny, VMEM-resident) --------
        w_ih0 = lstm_ref[o_ih0:o_ih0 + 1, :]                      # (1, 4H)
        b0    = lstm_ref[o_b:o_b + 1, :]                          # (1, 4H)
        w_hh  = [lstm_ref[o_hh + l * H:o_hh + (l + 1) * H, :]     # (H, 4H)
                 for l in range(L)]
        w_ih  = [None] + [lstm_ref[o_ih + (l - 1) * H:o_ih + l * H, :]
                          for l in range(1, L)]                   # (H, 4H)
        bias  = [lstm_ref[o_b + l:o_b + l + 1, :] for l in range(L)]

        # ---- layer-0 input->gate term for every timestep (rank-1 bcast) ----
        # (S*B, 1) * (1, 4H): no H-deep contraction over 31/32 zeros.
        gates_x0 = x_ref[...] * w_ih0 + b0                        # (S*B, 4H)

        # ---- wavefront recurrence: t outer, l inner ------------------------
        # cell(l, t) depends only on cell(l, t-1) and cell(l-1, t); the flat
        # unrolled block lets the scheduler overlap the layers diagonally.
        h = [jnp.zeros((B, H), jnp.float32) for _ in range(L)]
        c = [jnp.zeros((B, H), jnp.float32) for _ in range(L)]
        hs_top = []
        for t in range(S):                                        # static unroll
            for l in range(L):                                    # static unroll
                if l == 0:
                    g = (gates_x0[t * B:(t + 1) * B, :]
                         + jnp.dot(h[0], w_hh[0],
                                   preferred_element_type=jnp.float32))
                else:
                    # Per-step input matmul (no full-sequence barrier); kept as
                    # two dots so h[l] @ w_hh can issue before h[l-1] is ready.
                    g = (jnp.dot(h[l - 1], w_ih[l],
                                 preferred_element_type=jnp.float32)
                         + jnp.dot(h[l], w_hh[l],
                                   preferred_element_type=jnp.float32)
                         + bias[l])
                # Two full-vreg EUP pushes cover all four gate activations:
                #   sigmoid(x) == 0.5 * tanh(0.5 * x) + 0.5
                s_all = 0.5 * jnp.tanh(0.5 * g) + 0.5             # i, f, o gates
                t_all = jnp.tanh(g)                               # g gate
                i_g = s_all[:, 0 * H:1 * H]
                f_g = s_all[:, 1 * H:2 * H]
                g_g = t_all[:, 2 * H:3 * H]
                o_g = s_all[:, 3 * H:4 * H]
                c[l] = f_g * c[l] + i_g * g_g
                h[l] = o_g * jnp.tanh(c[l])
            hs_top.append(h[L - 1])

        # TODO(synk): nn.Dropout(p=0.5) is identity in eval mode; training-mode
        # dropout (PyTorch RNG stream) is not reproduced here.

        # ---- final Linear: one batched matmul, lane-dense full-width store --
        seq = jnp.concatenate(hs_top, axis=0)                     # (S*B, H)
        w_lin = lin_ref[0:H, :]                                   # (H, OUT_PAD)
        b_lin = lin_ref[H:H + 1, :]                               # (1, OUT_PAD)
        out_ref[...] = (jnp.dot(seq, w_lin, preferred_element_type=jnp.float32)
                        + b_lin)

    return kernel


# -----------------------------------------------------------------------------
# Wrapper: layout glue (batch padding / transposes / pallas_call plumbing)
# -----------------------------------------------------------------------------
def lstm_univariate_forward(x, kparams):
    """x: (B, S, 1) float32 batch-first. Returns (B, S, 4)."""
    B, S, _ = x.shape
    H, L = kparams["H"], kparams["L"]
    B_pad = ((B + 7) // 8) * 8                     # sublane-full batch tiles

    x_tm = jnp.transpose(x, (1, 0, 2))             # (S, B, 1) time-major
    x_padded = jnp.zeros((S, B_pad, 1), jnp.float32).at[:, :B, :].set(x_tm)
    x_flat = x_padded.reshape(S * B_pad, 1)        # (S*B_pad, 1)

    # Gridless: everything fits trivially in VMEM (<100 KiB) on v5e/v6e/v7x.
    # For large B add a leading batch-parallel grid axis (dimension_semantics=
    # ("parallel", ...)) to engage v7x's second TensorCore.
    out_flat = pl.pallas_call(
        make_lstm_kernel(S, B_pad, H, L, kparams["lstm_offs"]),
        out_shape=jax.ShapeDtypeStruct((S * B_pad, OUT_PAD), jnp.float32),
        in_specs=[pl.BlockSpec(memory_space=pltpu.MemorySpace.VMEM)] * 3,
        out_specs=pl.BlockSpec(memory_space=pltpu.MemorySpace.VMEM),
    )(x_flat, kparams["lstm_slab"], kparams["lin_slab"])

    out = out_flat[:, :OUT_DIM].reshape(S, B_pad, OUT_DIM)[:, :B, :]
    return jnp.transpose(out, (1, 0, 2))           # (B, S, 4) batch-first


# -----------------------------------------------------------------------------
# Deterministic parameter init (PyTorch-style U(-1/sqrt(H), 1/sqrt(H))) and
# packing into the two kernel slabs.
# -----------------------------------------------------------------------------
def init_params(key, cell_count, layers):
    H, L = cell_count, layers
    bound = 1.0 / float(np.sqrt(H))
    keys = jax.random.split(key, 4 * L + 2)

    raw_lstm, w_ih_rest_t, w_hh_t, b_rows = [], [], [], []
    w_ih0_t = None
    k = 0
    for l in range(L):
        in_dim = 1 if l == 0 else H
        w_ih = jax.random.uniform(keys[k], (4 * H, in_dim), jnp.float32,
                                  -bound, bound); k += 1
        w_hh = jax.random.uniform(keys[k], (4 * H, H), jnp.float32,
                                  -bound, bound); k += 1
        b_ih = jax.random.uniform(keys[k], (4 * H,), jnp.float32,
                                  -bound, bound); k += 1
        b_hh = jax.random.uniform(keys[k], (4 * H,), jnp.float32,
                                  -bound, bound); k += 1
        raw_lstm.append((w_ih, w_hh, b_ih, b_hh))
        if l == 0:
            w_ih0_t = w_ih.T                       # (1, 4H)
        else:
            w_ih_rest_t.append(w_ih.T)             # (H, 4H)
        w_hh_t.append(w_hh.T)                      # (H, 4H)
        b_rows.append((b_ih + b_hh)[None, :])      # (1, 4H) combined bias

    w_lin = jax.random.uniform(keys[k], (OUT_DIM, H), jnp.float32,
                               -bound, bound); k += 1
    b_lin = jax.random.uniform(keys[k], (OUT_DIM,), jnp.float32, -bound, bound)

    # ---- pack LSTM weights/biases into one (rows, 4H) slab, 8-aligned ------
    def pad_rows8(a):
        pad = (-a.shape[0]) % 8
        if pad:
            a = jnp.concatenate([a, jnp.zeros((pad, a.shape[1]), a.dtype)], 0)
        return a

    segs, row = [], 0

    def add_seg(a):
        nonlocal row
        start = row
        a8 = pad_rows8(a)
        segs.append(a8)
        row += a8.shape[0]
        return start

    o_ih0 = add_seg(w_ih0_t)
    o_ih = add_seg(jnp.concatenate(w_ih_rest_t, axis=0)) if L > 1 else row
    o_hh = add_seg(jnp.concatenate(w_hh_t, axis=0))
    o_b = add_seg(jnp.concatenate(b_rows, axis=0))
    lstm_slab = jnp.concatenate(segs, axis=0)      # (R, 4H)

    # ---- pack Linear into one lane-dense (rows, OUT_PAD) slab --------------
    w_lin_pad = jnp.zeros((H, OUT_PAD), jnp.float32).at[:, :OUT_DIM].set(w_lin.T)
    b_lin_pad = jnp.zeros((1, OUT_PAD), jnp.float32).at[:, :OUT_DIM].set(b_lin[None, :])
    lin_slab = pad_rows8(jnp.concatenate([w_lin_pad, b_lin_pad], axis=0))

    kparams = {
        "lstm_slab": lstm_slab,
        "lin_slab": lin_slab,
        "lstm_offs": (o_ih0, o_ih, o_hh, o_b),
        "H": H,
        "L": L,
    }
    raw = {"lstm": raw_lstm, "w_lin": w_lin, "b_lin": b_lin}
    return kparams, raw


# -----------------------------------------------------------------------------
# Pure-JAX reference (mirrors torch.nn.LSTM + Linear, eval-mode dropout)
# -----------------------------------------------------------------------------
def reference_forward(x, raw, cell_count, layers):
    H = cell_count
    B, S, _ = x.shape
    inp = x
    for l in range(layers):
        w_ih, w_hh, b_ih, b_hh = raw["lstm"][l]
        h = jnp.zeros((B, H), jnp.float32)
        c = jnp.zeros((B, H), jnp.float32)
        outs = []
        for t in range(S):
            g = inp[:, t, :] @ w_ih.T + b_ih + h @ w_hh.T + b_hh
            i = jax.nn.sigmoid(g[:, :H])
            f = jax.nn.sigmoid(g[:, H:2 * H])
            gg = jnp.tanh(g[:, 2 * H:3 * H])
            o = jax.nn.sigmoid(g[:, 3 * H:])
            c = f * c + i * gg
            h = o * jnp.tanh(c)
            outs.append(h)
        inp = jnp.stack(outs, axis=1)
    return inp @ raw["w_lin"].T + raw["b_lin"]


if __name__ == "__main__":
    CELL_COUNT = 32   # hidden size
    LAYERS = 2
    BATCH = 2
    SEQ = 8

    key = jax.random.PRNGKey(0)
    kp, kx = jax.random.split(key)
    kparams, raw = init_params(kp, CELL_COUNT, LAYERS)
    x = jax.random.normal(kx, (BATCH, SEQ, 1), jnp.float32)

    out = lstm_univariate_forward(x, kparams)
    out = jax.block_until_ready(out)

    ref = reference_forward(x, raw, CELL_COUNT, LAYERS)
    assert out.shape == (BATCH, SEQ, 4), out.shape
    assert np.allclose(np.asarray(out), np.asarray(ref), atol=2e-3, rtol=2e-3), (
        "max diff %g" % float(np.max(np.abs(np.asarray(out) - np.asarray(ref)))))

    print("KERNEL_OK")
</pallas_src>

<mosaic_0001>
module attributes {stable_mosaic.version = 11 : i64} {
  func.func @kernel(%arg0: memref<64x1xf32, #tpu.memory_space<vmem>>, %arg1: memref<112x128xf32, #tpu.memory_space<vmem>>, %arg2: memref<40x128xf32, #tpu.memory_space<vmem>>, %arg3: memref<64x128xf32, #tpu.memory_space<vmem>>) attributes {dimension_semantics = [], scalar_prefetch = 0 : i64, scratch_operands = 0 : i64, tpu.core_type = #tpu.core_type<tc>} {
    %c0 = arith.constant 0 : index
    %c0_0 = arith.constant 0 : index
    %0 = vector.load %arg1[%c0, %c0_0] : memref<112x128xf32, #tpu.memory_space<vmem>>, vector<1x128xf32>
    %c104 = arith.constant 104 : index
    %c0_1 = arith.constant 0 : index
    %1 = vector.load %arg1[%c104, %c0_1] : memref<112x128xf32, #tpu.memory_space<vmem>>, vector<1x128xf32>
    %c40 = arith.constant 40 : index
    %c0_2 = arith.constant 0 : index
    %2 = vector.load %arg1[%c40, %c0_2] : memref<112x128xf32, #tpu.memory_space<vmem>>, vector<32x128xf32>
    %c72 = arith.constant 72 : index
    %c0_3 = arith.constant 0 : index
    %3 = vector.load %arg1[%c72, %c0_3] : memref<112x128xf32, #tpu.memory_space<vmem>>, vector<32x128xf32>
    %c8 = arith.constant 8 : index
    %c0_4 = arith.constant 0 : index
    %4 = vector.load %arg1[%c8, %c0_4] : memref<112x128xf32, #tpu.memory_space<vmem>>, vector<32x128xf32>
    %c105 = arith.constant 105 : index
    %c0_5 = arith.constant 0 : index
    %5 = vector.load %arg1[%c105, %c0_5] : memref<112x128xf32, #tpu.memory_space<vmem>>, vector<1x128xf32>
    %c0_6 = arith.constant 0 : index
    %c0_7 = arith.constant 0 : index
    %6 = vector.load %arg0[%c0_6, %c0_7] : memref<64x1xf32, #tpu.memory_space<vmem>>, vector<64x1xf32>
    %7 = vector.broadcast %6 : vector<64x1xf32> to vector<64x128xf32>
    %8 = vector.broadcast %0 : vector<1x128xf32> to vector<64x128xf32>
    %9 = arith.mulf %7, %8 : vector<64x128xf32>
    %10 = vector.broadcast %1 : vector<1x128xf32> to vector<64x128xf32>
    %11 = arith.addf %9, %10 : vector<64x128xf32>
    %cst = arith.constant 0.000000e+00 : f32
    %12 = vector.broadcast %cst : f32 to vector<8x32xf32>
    %cst_8 = arith.constant 0.000000e+00 : f32
    %13 = vector.broadcast %cst_8 : f32 to vector<8x32xf32>
    %cst_9 = arith.constant 0.000000e+00 : f32
    %14 = vector.broadcast %cst_9 : f32 to vector<8x32xf32>
    %cst_10 = arith.constant 0.000000e+00 : f32
    %15 = vector.broadcast %cst_10 : f32 to vector<8x32xf32>
    %16 = vector.extract_strided_slice %11 {offsets = [0, 0], sizes = [8, 128], strides = [1, 1]} : vector<64x128xf32> to vector<8x128xf32>
    %cst_11 = arith.constant dense<0.000000e+00> : vector<8x128xf32>
    %17 = tpu.matmul %12, %2, %cst_11 {dimension_numbers = #tpu.dot_dimension_numbers<[1], [0], [0], [1], [0, 0, 1, 1], [], []>} : vector<8x32xf32>, vector<32x128xf32>, vector<8x128xf32> -> vector<8x128xf32>
    %18 = arith.addf %16, %17 : vector<8x128xf32>
    %cst_12 = arith.constant 5.000000e-01 : f32
    %19 = vector.broadcast %cst_12 : f32 to vector<8x128xf32>
    %20 = arith.mulf %19, %18 : vector<8x128xf32>
    %21 = math.tanh %20 : vector<8x128xf32>
    %cst_13 = arith.constant 5.000000e-01 : f32
    %22 = vector.broadcast %cst_13 : f32 to vector<8x128xf32>
    %23 = arith.mulf %22, %21 : vector<8x128xf32>
    %cst_14 = arith.constant 5.000000e-01 : f32
    %24 = vector.broadcast %cst_14 : f32 to vector<8x128xf32>
    %25 = arith.addf %23, %24 : vector<8x128xf32>
    %26 = math.tanh %18 : vector<8x128xf32>
    %27 = vector.extract_strided_slice %25 {offsets = [0, 0], sizes = [8, 32], strides = [1, 1]} : vector<8x128xf32> to vector<8x32xf32>
    %28 = vector.extract_strided_slice %25 {offsets = [0, 32], sizes = [8, 32], strides = [1, 1]} : vector<8x128xf32> to vector<8x32xf32>
    %29 = vector.extract_strided_slice %26 {offsets = [0, 64], sizes = [8, 32], strides = [1, 1]} : vector<8x128xf32> to vector<8x32xf32>
    %30 = vector.extract_strided_slice %25 {offsets = [0, 96], sizes = [8, 32], strides = [1, 1]} : vector<8x128xf32> to vector<8x32xf32>
    %31 = arith.mulf %28, %14 : vector<8x32xf32>
    %32 = arith.mulf %27, %29 : vector<8x32xf32>
    %33 = arith.addf %31, %32 : vector<8x32xf32>
    %34 = math.tanh %33 : vector<8x32xf32>
    %35 = arith.mulf %30, %34 : vector<8x32xf32>
    %cst_15 = arith.constant dense<0.000000e+00> : vector<8x128xf32>
    %36 = tpu.matmul %35, %4, %cst_15 {dimension_numbers = #tpu.dot_dimension_numbers<[1], [0], [0], [1], [0, 0, 1, 1], [], []>} : vector<8x32xf32>, vector<32x128xf32>, vector<8x128xf32> -> vector<8x128xf32>
    %cst_16 = arith.constant dense<0.000000e+00> : vector<8x128xf32>
    %37 = tpu.matmul %13, %3, %cst_16 {dimension_numbers = #tpu.dot_dimension_numbers<[1], [0], [0], [1], [0, 0, 1, 1], [], []>} : vector<8x32xf32>, vector<32x128xf32>, vector<8x128xf32> -> vector<8x128xf32>
    %38 = arith.addf %36, %37 : vector<8x128xf32>
    %39 = vector.broadcast %5 : vector<1x128xf32> to vector<8x128xf32>
    %40 = arith.addf %38, %39 : vector<8x128xf32>
    %cst_17 = arith.constant 5.000000e-01 : f32
    %41 = vector.broadcast %cst_17 : f32 to vector<8x128xf32>
    %42 = arith.mulf %41, %40 : vector<8x128xf32>
    %43 = math.tanh %42 : vector<8x128xf32>
    %cst_18 = arith.constant 5.000000e-01 : f32
    %44 = vector.broadcast %cst_18 : f32 to vector<8x128xf32>
    %45 = arith.mulf %44, %43 : vector<8x128xf32>
    %cst_19 = arith.constant 5.000000e-01 : f32
    %46 = vector.broadcast %cst_19 : f32 to vector<8x128xf32>
    %47 = arith.addf %45, %46 : vector<8x128xf32>
    %48 = math.tanh %40 : vector<8x128xf32>
    %49 = vector.extract_strided_slice %47 {offsets = [0, 0], sizes = [8, 32], strides = [1, 1]} : vector<8x128xf32> to vector<8x32xf32>
    %50 = vector.extract_strided_slice %47 {offsets = [0, 32], sizes = [8, 32], strides = [1, 1]} : vector<8x128xf32> to vector<8x32xf32>
    %51 = vector.extract_strided_slice %48 {offsets = [0, 64], sizes = [8, 32], strides = [1, 1]} : vector<8x128xf32> to vector<8x32xf32>
    %52 = vector.extract_strided_slice %47 {offsets = [0, 96], sizes = [8, 32], strides = [1, 1]} : vector<8x128xf32> to vector<8x32xf32>
    %53 = arith.mulf %50, %15 : vector<8x32xf32>
    %54 = arith.mulf %49, %51 : vector<8x32xf32>
    %55 = arith.addf %53, %54 : vector<8x32xf32>
    %56 = math.tanh %55 : vector<8x32xf32>
    %57 = arith.mulf %52, %56 : vector<8x32xf32>
    %58 = vector.extract_strided_slice %11 {offsets = [8, 0], sizes = [8, 128], strides = [1, 1]} : vector<64x128xf32> to vector<8x128xf32>
    %cst_20 = arith.constant dense<0.000000e+00> : vector<8x128xf32>
    %59 = tpu.matmul %35, %2, %cst_20 {dimension_numbers = #tpu.dot_dimension_numbers<[1], [0], [0], [1], [0, 0, 1, 1], [], []>} : vector<8x32xf32>, vector<32x128xf32>, vector<8x128xf32> -> vector<8x128xf32>
    %60 = arith.addf %58, %59 : vector<8x128xf32>
    %cst_21 = arith.constant 5.000000e-01 : f32
    %61 = vector.broadcast %cst_21 : f32 to vector<8x128xf32>
    %62 = arith.mulf %61, %60 : vector<8x128xf32>
    %63 = math.tanh %62 : vector<8x128xf32>
    %cst_22 = arith.constant 5.000000e-01 : f32
    %64 = vector.broadcast %cst_22 : f32 to vector<8x128xf32>
    %65 = arith.mulf %64, %63 : vector<8x128xf32>
    %cst_23 = arith.constant 5.000000e-01 : f32
    %66 = vector.broadcast %cst_23 : f32 to vector<8x128xf32>
    %67 = arith.addf %65, %66 : vector<8x128xf32>
    %68 = math.tanh %60 : vector<8x128xf32>
    %69 = vector.extract_strided_slice %67 {offsets = [0, 0], sizes = [8, 32], strides = [1, 1]} : vector<8x128xf32> to vector<8x32xf32>
    %70 = vector.extract_strided_slice %67 {offsets = [0, 32], sizes = [8, 32], strides = [1, 1]} : vector<8x128xf32> to vector<8x32xf32>
    %71 = vector.extract_strided_slice %68 {offsets = [0, 64], sizes = [8, 32], strides = [1, 1]} : vector<8x128xf32> to vector<8x32xf32>
    %72 = vector.extract_strided_slice %67 {offsets = [0, 96], sizes = [8, 32], strides = [1, 1]} : vector<8x128xf32> to vector<8x32xf32>
    %73 = arith.mulf %70, %33 : vector<8x32xf32>
    %74 = arith.mulf %69, %71 : vector<8x32xf32>
    %75 = arith.addf %73, %74 : vector<8x32xf32>
    %76 = math.tanh %75 : vector<8x32xf32>
    %77 = arith.mulf %72, %76 : vector<8x32xf32>
    %cst_24 = arith.constant dense<0.000000e+00> : vector<8x128xf32>
    %78 = tpu.matmul %77, %4, %cst_24 {dimension_numbers = #tpu.dot_dimension_numbers<[1], [0], [0], [1], [0, 0, 1, 1], [], []>} : vector<8x32xf32>, vector<32x128xf32>, vector<8x128xf32> -> vector<8x128xf32>
    %cst_25 = arith.constant dense<0.000000e+00> : vector<8x128xf32>
    %79 = tpu.matmul %57, %3, %cst_25 {dimension_numbers = #tpu.dot_dimension_numbers<[1], [0], [0], [1], [0, 0, 1, 1], [], []>} : vector<8x32xf32>, vector<32x128xf32>, vector<8x128xf32> -> vector<8x128xf32>
    %80 = arith.addf %78, %79 : vector<8x128xf32>
    %81 = vector.broadcast %5 : vector<1x128xf32> to vector<8x128xf32>
    %82 = arith.addf %80, %81 : vector<8x128xf32>
    %cst_26 = arith.constant 5.000000e-01 : f32
    %83 = vector.broadcast %cst_26 : f32 to vector<8x128xf32>
    %84 = arith.mulf %83, %82 : vector<8x128xf32>
    %85 = math.tanh %84 : vector<8x128xf32>
    %cst_27 = arith.constant 5.000000e-01 : f32
    %86 = vector.broadcast %cst_27 : f32 to vector<8x128xf32>
    %87 = arith.mulf %86, %85 : vector<8x128xf32>
    %cst_28 = arith.constant 5.000000e-01 : f32
    %88 = vector.broadcast %cst_28 : f32 to vector<8x128xf32>
    %89 = arith.addf %87, %88 : vector<8x128xf32>
    %90 = math.tanh %82 : vector<8x128xf32>
    %91 = vector.extract_strided_slice %89 {offsets = [0, 0], sizes = [8, 32], strides = [1, 1]} : vector<8x128xf32> to vector<8x32xf32>
    %92 = vector.extract_strided_slice %89 {offsets = [0, 32], sizes = [8, 32], strides = [1, 1]} : vector<8x128xf32> to vector<8x32xf32>
    %93 = vector.extract_strided_slice %90 {offsets = [0, 64], sizes = [8, 32], strides = [1, 1]} : vector<8x128xf32> to vector<8x32xf32>
    %94 = vector.extract_strided_slice %89 {offsets = [0, 96], sizes = [8, 32], strides = [1, 1]} : vector<8x128xf32> to vector<8x32xf32>
    %95 = arith.mulf %92, %55 : vector<8x32xf32>
    %96 = arith.mulf %91, %93 : vector<8x32xf32>
    %97 = arith.addf %95, %96 : vector<8x32xf32>
    %98 = math.tanh %97 : vector<8x32xf32>
    %99 = arith.mulf %94, %98 : vector<8x32xf32>
    %100 = vector.extract_strided_slice %11 {offsets = [16, 0], sizes = [8, 128], strides = [1, 1]} : vector<64x128xf32> to vector<8x128xf32>
    %cst_29 = arith.constant dense<0.000000e+00> : vector<8x128xf32>
    %101 = tpu.matmul %77, %2, %cst_29 {dimension_numbers = #tpu.dot_dimension_numbers<[1], [0], [0], [1], [0, 0, 1, 1], [], []>} : vector<8x32xf32>, vector<32x128xf32>, vector<8x128xf32> -> vector<8x128xf32>
    %102 = arith.addf %100, %101 : vector<8x128xf32>
    %cst_30 = arith.constant 5.000000e-01 : f32
    %103 = vector.broadcast %cst_30 : f32 to vector<8x128xf32>
    %104 = arith.mulf %103, %102 : vector<8x128xf32>
    %105 = math.tanh %104 : vector<8x128xf32>
    %cst_31 = arith.constant 5.000000e-01 : f32
    %106 = vector.broadcast %cst_31 : f32 to vector<8x128xf32>
    %107 = arith.mulf %106, %105 : vector<8x128xf32>
    %cst_32 = arith.constant 5.000000e-01 : f32
    %108 = vector.broadcast %cst_32 : f32 to vector<8x128xf32>
    %109 = arith.addf %107, %108 : vector<8x128xf32>
    %110 = math.tanh %102 : vector<8x128xf32>
    %111 = vector.extract_strided_slice %109 {offsets = [0, 0], sizes = [8, 32], strides = [1, 1]} : vector<8x128xf32> to vector<8x32xf32>
    %112 = vector.extract_strided_slice %109 {offsets = [0, 32], sizes = [8, 32], strides = [1, 1]} : vector<8x128xf32> to vector<8x32xf32>
    %113 = vector.extract_strided_slice %110 {offsets = [0, 64], sizes = [8, 32], strides = [1, 1]} : vector<8x128xf32> to vector<8x32xf32>
    %114 = vector.extract_strided_slice %109 {offsets = [0, 96], sizes = [8, 32], strides = [1, 1]} : vector<8x128xf32> to vector<8x32xf32>
    %115 = arith.mulf %112, %75 : vector<8x32xf32>
    %116 = arith.mulf %111, %113 : vector<8x32xf32>
    %117 = arith.addf %115, %116 : vector<8x32xf32>
    %118 = math.tanh %117 : vector<8x32xf32>
    %119 = arith.mulf %114, %118 : vector<8x32xf32>
    %cst_33 = arith.constant dense<0.000000e+00> : vector<8x128xf32>
    %120 = tpu.matmul %119, %4, %cst_33 {dimension_numbers = #tpu.dot_dimension_numbers<[1], [0], [0], [1], [0, 0, 1, 1], [], []>} : vector<8x32xf32>, vector<32x128xf32>, vector<8x128xf32> -> vector<8x128xf32>
    %cst_34 = arith.constant dense<0.000000e+00> : vector<8x128xf32>
    %121 = tpu.matmul %99, %3, %cst_34 {dimension_numbers = #tpu.dot_dimension_numbers<[1], [0], [0], [1], [0, 0, 1, 1], [], []>} : vector<8x32xf32>, vector<32x128xf32>, vector<8x128xf32> -> vector<8x128xf32>
    %122 = arith.addf %120, %121 : vector<8x128xf32>
    %123 = vector.broadcast %5 : vector<1x128xf32> to vector<8x128xf32>
    %124 = arith.addf %122, %123 : vector<8x128xf32>
    %cst_35 = arith.constant 5.000000e-01 : f32
    %125 = vector.broadcast %cst_35 : f32 to vector<8x128xf32>
    %126 = arith.mulf %125, %124 : vector<8x128xf32>
    %127 = math.tanh %126 : vector<8x128xf32>
    %cst_36 = arith.constant 5.000000e-01 : f32
    %128 = vector.broadcast %cst_36 : f32 to vector<8x128xf32>
    %129 = arith.mulf %128, %127 : vector<8x128xf32>
    %cst_37 = arith.constant 5.000000e-01 : f32
    %130 = vector.broadcast %cst_37 : f32 to vector<8x128xf32>
    %131 = arith.addf %129, %130 : vector<8x128xf32>
    %132 = math.tanh %124 : vector<8x128xf32>
    %133 = vector.extract_strided_slice %131 {offsets = [0, 0], sizes = [8, 32], strides = [1, 1]} : vector<8x128xf32> to vector<8x32xf32>
    %134 = vector.extract_strided_slice %131 {offsets = [0, 32], sizes = [8, 32], strides = [1, 1]} : vector<8x128xf32> to vector<8x32xf32>
    %135 = vector.extract_strided_slice %132 {offsets = [0, 64], sizes = [8, 32], strides = [1, 1]} : vector<8x128xf32> to vector<8x32xf32>
    %136 = vector.extract_strided_slice %131 {offsets = [0, 96], sizes = [8, 32], strides = [1, 1]} : vector<8x128xf32> to vector<8x32xf32>
    %137 = arith.mulf %134, %97 : vector<8x32xf32>
    %138 = arith.mulf %133, %135 : vector<8x32xf32>
    %139 = arith.addf %137, %138 : vector<8x32xf32>
    %140 = math.tanh %139 : vector<8x32xf32>
    %141 = arith.mulf %136, %140 : vector<8x32xf32>
    %142 = vector.extract_strided_slice %11 {offsets = [24, 0], sizes = [8, 128], strides = [1, 1]} : vector<64x128xf32> to vector<8x128xf32>
    %cst_38 = arith.constant dense<0.000000e+00> : vector<8x128xf32>
    %143 = tpu.matmul %119, %2, %cst_38 {dimension_numbers = #tpu.dot_dimension_numbers<[1], [0], [0], [1], [0, 0, 1, 1], [], []>} : vector<8x32xf32>, vector<32x128xf32>, vector<8x128xf32> -> vector<8x128xf32>
    %144 = arith.addf %142, %143 : vector<8x128xf32>
    %cst_39 = arith.constant 5.000000e-01 : f32
    %145 = vector.broadcast %cst_39 : f32 to vector<8x128xf32>
    %146 = arith.mulf %145, %144 : vector<8x128xf32>
    %147 = math.tanh %146 : vector<8x128xf32>
    %cst_40 = arith.constant 5.000000e-01 : f32
    %148 = vector.broadcast %cst_40 : f32 to vector<8x128xf32>
    %149 = arith.mulf %148, %147 : vector<8x128xf32>
    %cst_41 = arith.constant 5.000000e-01 : f32
    %150 = vector.broadcast %cst_41 : f32 to vector<8x128xf32>
    %151 = arith.addf %149, %150 : vector<8x128xf32>
    %152 = math.tanh %144 : vector<8x128xf32>
    %153 = vector.extract_strided_slice %151 {offsets = [0, 0], sizes = [8, 32], strides = [1, 1]} : vector<8x128xf32> to vector<8x32xf32>
    %154 = vector.extract_strided_slice %151 {offsets = [0, 32], sizes = [8, 32], strides = [1, 1]} : vector<8x128xf32> to vector<8x32xf32>
    %155 = vector.extract_strided_slice %152 {offsets = [0, 64], sizes = [8, 32], strides = [1, 1]} : vector<8x128xf32> to vector<8x32xf32>
    %156 = vector.extract_strided_slice %151 {offsets = [0, 96], sizes = [8, 32], strides = [1, 1]} : vector<8x128xf32> to vector<8x32xf32>
    %157 = arith.mulf %154, %117 : vector<8x32xf32>
    %158 = arith.mulf %153, %155 : vector<8x32xf32>
    %159 = arith.addf %157, %158 : vector<8x32xf32>
    %160 = math.tanh %159 : vector<8x32xf32>
    %161 = arith.mulf %156, %160 : vector<8x32xf32>
    %cst_42 = arith.constant dense<0.000000e+00> : vector<8x128xf32>
    %162 = tpu.matmul %161, %4, %cst_42 {dimension_numbers = #tpu.dot_dimension_numbers<[1], [0], [0], [1], [0, 0, 1, 1], [], []>} : vector<8x32xf32>, vector<32x128xf32>, vector<8x128xf32> -> vector<8x128xf32>
    %cst_43 = arith.constant dense<0.000000e+00> : vector<8x128xf32>
    %163 = tpu.matmul %141, %3, %cst_43 {dimension_numbers = #tpu.dot_dimension_numbers<[1], [0], [0], [1], [0, 0, 1, 1], [], []>} : vector<8x32xf32>, vector<32x128xf32>, vector<8x128xf32> -> vector<8x128xf32>
    %164 = arith.addf %162, %163 : vector<8x128xf32>
    %165 = vector.broadcast %5 : vector<1x128xf32> to vector<8x128xf32>
    %166 = arith.addf %164, %165 : vector<8x128xf32>
    %cst_44 = arith.constant 5.000000e-01 : f32
    %167 = vector.broadcast %cst_44 : f32 to vector<8x128xf32>
    %168 = arith.mulf %167, %166 : vector<8x128xf32>
    %169 = math.tanh %168 : vector<8x128xf32>
    %cst_45 = arith.constant 5.000000e-01 : f32
    %170 = vector.broadcast %cst_45 : f32 to vector<8x128xf32>
    %171 = arith.mulf %170, %169 : vector<8x128xf32>
    %cst_46 = arith.constant 5.000000e-01 : f32
    %172 = vector.broadcast %cst_46 : f32 to vector<8x128xf32>
    %173 = arith.addf %171, %172 : vector<8x128xf32>
    %174 = math.tanh %166 : vector<8x128xf32>
    %175 = vector.extract_strided_slice %173 {offsets = [0, 0], sizes = [8, 32], strides = [1, 1]} : vector<8x128xf32> to vector<8x32xf32>
    %176 = vector.extract_strided_slice %173 {offsets = [0, 32], sizes = [8, 32], strides = [1, 1]} : vector<8x128xf32> to vector<8x32xf32>
    %177 = vector.extract_strided_slice %174 {offsets = [0, 64], sizes = [8, 32], strides = [1, 1]} : vector<8x128xf32> to vector<8x32xf32>
    %178 = vector.extract_strided_slice %173 {offsets = [0, 96], sizes = [8, 32], strides = [1, 1]} : vector<8x128xf32> to vector<8x32xf32>
    %179 = arith.mulf %176, %139 : vector<8x32xf32>
    %180 = arith.mulf %175, %177 : vector<8x32xf32>
    %181 = arith.addf %179, %180 : vector<8x32xf32>
    %182 = math.tanh %181 : vector<8x32xf32>
    %183 = arith.mulf %178, %182 : vector<8x32xf32>
    %184 = vector.extract_strided_slice %11 {offsets = [32, 0], sizes = [8, 128], strides = [1, 1]} : vector<64x128xf32> to vector<8x128xf32>
    %cst_47 = arith.constant dense<0.000000e+00> : vector<8x128xf32>
    %185 = tpu.matmul %161, %2, %cst_47 {dimension_numbers = #tpu.dot_dimension_numbers<[1], [0], [0], [1], [0, 0, 1, 1], [], []>} : vector<8x32xf32>, vector<32x128xf32>, vector<8x128xf32> -> vector<8x128xf32>
    %186 = arith.addf %184, %185 : vector<8x128xf32>
    %cst_48 = arith.constant 5.000000e-01 : f32
    %187 = vector.broadcast %cst_48 : f32 to vector<8x128xf32>
    %188 = arith.mulf %187, %186 : vector<8x128xf32>
    %189 = math.tanh %188 : vector<8x128xf32>
    %cst_49 = arith.constant 5.000000e-01 : f32
    %190 = vector.broadcast %cst_49 : f32 to vector<8x128xf32>
    %191 = arith.mulf %190, %189 : vector<8x128xf32>
    %cst_50 = arith.constant 5.000000e-01 : f32
    %192 = vector.broadcast %cst_50 : f32 to vector<8x128xf32>
    %193 = arith.addf %191, %192 : vector<8x128xf32>
    %194 = math.tanh %186 : vector<8x128xf32>
    %195 = vector.extract_strided_slice %193 {offsets = [0, 0], sizes = [8, 32], strides = [1, 1]} : vector<8x128xf32> to vector<8x32xf32>
    %196 = vector.extract_strided_slice %193 {offsets = [0, 32], sizes = [8, 32], strides = [1, 1]} : vector<8x128xf32> to vector<8x32xf32>
    %197 = vector.extract_strided_slice %194 {offsets = [0, 64], sizes = [8, 32], strides = [1, 1]} : vector<8x128xf32> to vector<8x32xf32>
    %198 = vector.extract_strided_slice %193 {offsets = [0, 96], sizes = [8, 32], strides = [1, 1]} : vector<8x128xf32> to vector<8x32xf32>
    %199 = arith.mulf %196, %159 : vector<8x32xf32>
    %200 = arith.mulf %195, %197 : vector<8x32xf32>
    %201 = arith.addf %199, %200 : vector<8x32xf32>
    %202 = math.tanh %201 : vector<8x32xf32>
    %203 = arith.mulf %198, %202 : vector<8x32xf32>
    %cst_51 = arith.constant dense<0.000000e+00> : vector<8x128xf32>
    %204 = tpu.matmul %203, %4, %cst_51 {dimension_numbers = #tpu.dot_dimension_numbers<[1], [0], [0], [1], [0, 0, 1, 1], [], []>} : vector<8x32xf32>, vector<32x128xf32>, vector<8x128xf32> -> vector<8x128xf32>
    %cst_52 = arith.constant dense<0.000000e+00> : vector<8x128xf32>
    %205 = tpu.matmul %183, %3, %cst_52 {dimension_numbers = #tpu.dot_dimension_numbers<[1], [0], [0], [1], [0, 0, 1, 1], [], []>} : vector<8x32xf32>, vector<32x128xf32>, vector<8x128xf32> -> vector<8x128xf32>
    %206 = arith.addf %204, %205 : vector<8x128xf32>
    %207 = vector.broadcast %5 : vector<1x128xf32> to vector<8x128xf32>
    %208 = arith.addf %206, %207 : vector<8x128xf32>
    %cst_53 = arith.constant 5.000000e-01 : f32
    %209 = vector.broadcast %cst_53 : f32 to vector<8x128xf32>
    %210 = arith.mulf %209, %208 : vector<8x128xf32>
    %211 = math.tanh %210 : vector<8x128xf32>
    %cst_54 = arith.constant 5.000000e-01 : f32
    %212 = vector.broadcast %cst_54 : f32 to vector<8x128xf32>
    %213 = arith.mulf %212, %211 : vector<8x128xf32>
    %cst_55 = arith.constant 5.000000e-01 : f32
    %214 = vector.broadcast %cst_55 : f32 to vector<8x128xf32>
    %215 = arith.addf %213, %214 : vector<8x128xf32>
    %216 = math.tanh %208 : vector<8x128xf32>
    %217 = vector.extract_strided_slice %215 {offsets = [0, 0], sizes = [8, 32], strides = [1, 1]} : vector<8x128xf32> to vector<8x32xf32>
    %218 = vector.extract_strided_slice %215 {offsets = [0, 32], sizes = [8, 32], strides = [1, 1]} : vector<8x128xf32> to vector<8x32xf32>
    %219 = vector.extract_strided_slice %216 {offsets = [0, 64], sizes = [8, 32], strides = [1, 1]} : vector<8x128xf32> to vector<8x32xf32>
    %220 = vector.extract_strided_slice %215 {offsets = [0, 96], sizes = [8, 32], strides = [1, 1]} : vector<8x128xf32> to vector<8x32xf32>
    %221 = arith.mulf %218, %181 : vector<8x32xf32>
    %222 = arith.mulf %217, %219 : vector<8x32xf32>
    %223 = arith.addf %221, %222 : vector<8x32xf32>
    %224 = math.tanh %223 : vector<8x32xf32>
    %225 = arith.mulf %220, %224 : vector<8x32xf32>
    %226 = vector.extract_strided_slice %11 {offsets = [40, 0], sizes = [8, 128], strides = [1, 1]} : vector<64x128xf32> to vector<8x128xf32>
    %cst_56 = arith.constant dense<0.000000e+00> : vector<8x128xf32>
    %227 = tpu.matmul %203, %2, %cst_56 {dimension_numbers = #tpu.dot_dimension_numbers<[1], [0], [0], [1], [0, 0, 1, 1], [], []>} : vector<8x32xf32>, vector<32x128xf32>, vector<8x128xf32> -> vector<8x128xf32>
    %228 = arith.addf %226, %227 : vector<8x128xf32>
    %cst_57 = arith.constant 5.000000e-01 : f32
    %229 = vector.broadcast %cst_57 : f32 to vector<8x128xf32>
    %230 = arith.mulf %229, %228 : vector<8x128xf32>
    %231 = math.tanh %230 : vector<8x128xf32>
    %cst_58 = arith.constant 5.000000e-01 : f32
    %232 = vector.broadcast %cst_58 : f32 to vector<8x128xf32>
    %233 = arith.mulf %232, %231 : vector<8x128xf32>
    %cst_59 = arith.constant 5.000000e-01 : f32
    %234 = vector.broadcast %cst_59 : f32 to vector<8x128xf32>
    %235 = arith.addf %233, %234 : vector<8x128xf32>
    %236 = math.tanh %228 : vector<8x128xf32>
    %237 = vector.extract_strided_slice %235 {offsets = [0, 0], sizes = [8, 32], strides = [1, 1]} : vector<8x128xf32> to vector<8x32xf32>
    %238 = vector.extract_strided_slice %235 {offsets = [0, 32], sizes = [8, 32], strides = [1, 1]} : vector<8x128xf32> to vector<8x32xf32>
    %239 = vector.extract_strided_slice %236 {offsets = [0, 64], sizes = [8, 32], strides = [1, 1]} : vector<8x128xf32> to vector<8x32xf32>
    %240 = vector.extract_strided_slice %235 {offsets = [0, 96], sizes = [8, 32], strides = [1, 1]} : vector<8x128xf32> to vector<8x32xf32>
    %241 = arith.mulf %238, %201 : vector<8x32xf32>
    %242 = arith.mulf %237, %239 : vector<8x32xf32>
    %243 = arith.addf %241, %242 : vector<8x32xf32>
    %244 = math.tanh %243 : vector<8x32xf32>
    %245 = arith.mulf %240, %244 : vector<8x32xf32>
    %cst_60 = arith.constant dense<0.000000e+00> : vector<8x128xf32>
    %246 = tpu.matmul %245, %4, %cst_60 {dimension_numbers = #tpu.dot_dimension_numbers<[1], [0], [0], [1], [0, 0, 1, 1], [], []>} : vector<8x32xf32>, vector<32x128xf32>, vector<8x128xf32> -> vector<8x128xf32>
    %cst_61 = arith.constant dense<0.000000e+00> : vector<8x128xf32>
    %247 = tpu.matmul %225, %3, %cst_61 {dimension_numbers = #tpu.dot_dimension_numbers<[1], [0], [0], [1], [0, 0, 1, 1], [], []>} : vector<8x32xf32>, vector<32x128xf32>, vector<8x128xf32> -> vector<8x128xf32>
    %248 = arith.addf %246, %247 : vector<8x128xf32>
    %249 = vector.broadcast %5 : vector<1x128xf32> to vector<8x128xf32>
    %250 = arith.addf %248, %249 : vector<8x128xf32>
    %cst_62 = arith.constant 5.000000e-01 : f32
    %251 = vector.broadcast %cst_62 : f32 to vector<8x128xf32>
    %252 = arith.mulf %251, %250 : vector<8x128xf32>
    %253 = math.tanh %252 : vector<8x128xf32>
    %cst_63 = arith.constant 5.000000e-01 : f32
    %254 = vector.broadcast %cst_63 : f32 to vector<8x128xf32>
    %255 = arith.mulf %254, %253 : vector<8x128xf32>
    %cst_64 = arith.constant 5.000000e-01 : f32
    %256 = vector.broadcast %cst_64 : f32 to vector<8x128xf32>
    %257 = arith.addf %255, %256 : vector<8x128xf32>
    %258 = math.tanh %250 : vector<8x128xf32>
    %259 = vector.extract_strided_slice %257 {offsets = [0, 0], sizes = [8, 32], strides = [1, 1]} : vector<8x128xf32> to vector<8x32xf32>
    %260 = vector.extract_strided_slice %257 {offsets = [0, 32], sizes = [8, 32], strides = [1, 1]} : vector<8x128xf32> to vector<8x32xf32>
    %261 = vector.extract_strided_slice %258 {offsets = [0, 64], sizes = [8, 32], strides = [1, 1]} : vector<8x128xf32> to vector<8x32xf32>
    %262 = vector.extract_strided_slice %257 {offsets = [0, 96], sizes = [8, 32], strides = [1, 1]} : vector<8x128xf32> to vector<8x32xf32>
    %263 = arith.mulf %260, %223 : vector<8x32xf32>
    %264 = arith.mulf %259, %261 : vector<8x32xf32>
    %265 = arith.addf %263, %264 : vector<8x32xf32>
    %266 = math.tanh %265 : vector<8x32xf32>
    %267 = arith.mulf %262, %266 : vector<8x32xf32>
    %268 = vector.extract_strided_slice %11 {offsets = [48, 0], sizes = [8, 128], strides = [1, 1]} : vector<64x128xf32> to vector<8x128xf32>
    %cst_65 = arith.constant dense<0.000000e+00> : vector<8x128xf32>
    %269 = tpu.matmul %245, %2, %cst_65 {dimension_numbers = #tpu.dot_dimension_numbers<[1], [0], [0], [1], [0, 0, 1, 1], [], []>} : vector<8x32xf32>, vector<32x128xf32>, vector<8x128xf32> -> vector<8x128xf32>
    %270 = arith.addf %268, %269 : vector<8x128xf32>
    %cst_66 = arith.constant 5.000000e-01 : f32
    %271 = vector.broadcast %cst_66 : f32 to vector<8x128xf32>
    %272 = arith.mulf %271, %270 : vector<8x128xf32>
    %273 = math.tanh %272 : vector<8x128xf32>
    %cst_67 = arith.constant 5.000000e-01 : f32
    %274 = vector.broadcast %cst_67 : f32 to vector<8x128xf32>
    %275 = arith.mulf %274, %273 : vector<8x128xf32>
    %cst_68 = arith.constant 5.000000e-01 : f32
    %276 = vector.broadcast %cst_68 : f32 to vector<8x128xf32>
    %277 = arith.addf %275, %276 : vector<8x128xf32>
    %278 = math.tanh %270 : vector<8x128xf32>
    %279 = vector.extract_strided_slice %277 {offsets = [0, 0], sizes = [8, 32], strides = [1, 1]} : vector<8x128xf32> to vector<8x32xf32>
    %280 = vector.extract_strided_slice %277 {offsets = [0, 32], sizes = [8, 32], strides = [1, 1]} : vector<8x128xf32> to vector<8x32xf32>
    %281 = vector.extract_strided_slice %278 {offsets = [0, 64], sizes = [8, 32], strides = [1, 1]} : vector<8x128xf32> to vector<8x32xf32>
    %282 = vector.extract_strided_slice %277 {offsets = [0, 96], sizes = [8, 32], strides = [1, 1]} : vector<8x128xf32> to vector<8x32xf32>
    %283 = arith.mulf %280, %243 : vector<8x32xf32>
    %284 = arith.mulf %279, %281 : vector<8x32xf32>
    %285 = arith.addf %283, %284 : vector<8x32xf32>
    %286 = math.tanh %285 : vector<8x32xf32>
    %287 = arith.mulf %282, %286 : vector<8x32xf32>
    %cst_69 = arith.constant dense<0.000000e+00> : vector<8x128xf32>
    %288 = tpu.matmul %287, %4, %cst_69 {dimension_numbers = #tpu.dot_dimension_numbers<[1], [0], [0], [1], [0, 0, 1, 1], [], []>} : vector<8x32xf32>, vector<32x128xf32>, vector<8x128xf32> -> vector<8x128xf32>
    %cst_70 = arith.constant dense<0.000000e+00> : vector<8x128xf32>
    %289 = tpu.matmul %267, %3, %cst_70 {dimension_numbers = #tpu.dot_dimension_numbers<[1], [0], [0], [1], [0, 0, 1, 1], [], []>} : vector<8x32xf32>, vector<32x128xf32>, vector<8x128xf32> -> vector<8x128xf32>
    %290 = arith.addf %288, %289 : vector<8x128xf32>
    %291 = vector.broadcast %5 : vector<1x128xf32> to vector<8x128xf32>
    %292 = arith.addf %290, %291 : vector<8x128xf32>
    %cst_71 = arith.constant 5.000000e-01 : f32
    %293 = vector.broadcast %cst_71 : f32 to vector<8x128xf32>
    %294 = arith.mulf %293, %292 : vector<8x128xf32>
    %295 = math.tanh %294 : vector<8x128xf32>
    %cst_72 = arith.constant 5.000000e-01 : f32
    %296 = vector.broadcast %cst_72 : f32 to vector<8x128xf32>
    %297 = arith.mulf %296, %295 : vector<8x128xf32>
    %cst_73 = arith.constant 5.000000e-01 : f32
    %298 = vector.broadcast %cst_73 : f32 to vector<8x128xf32>
    %299 = arith.addf %297, %298 : vector<8x128xf32>
    %300 = math.tanh %292 : vector<8x128xf32>
    %301 = vector.extract_strided_slice %299 {offsets = [0, 0], sizes = [8, 32], strides = [1, 1]} : vector<8x128xf32> to vector<8x32xf32>
    %302 = vector.extract_strided_slice %299 {offsets = [0, 32], sizes = [8, 32], strides = [1, 1]} : vector<8x128xf32> to vector<8x32xf32>
    %303 = vector.extract_strided_slice %300 {offsets = [0, 64], sizes = [8, 32], strides = [1, 1]} : vector<8x128xf32> to vector<8x32xf32>
    %304 = vector.extract_strided_slice %299 {offsets = [0, 96], sizes = [8, 32], strides = [1, 1]} : vector<8x128xf32> to vector<8x32xf32>
    %305 = arith.mulf %302, %265 : vector<8x32xf32>
    %306 = arith.mulf %301, %303 : vector<8x32xf32>
    %307 = arith.addf %305, %306 : vector<8x32xf32>
    %308 = math.tanh %307 : vector<8x32xf32>
    %309 = arith.mulf %304, %308 : vector<8x32xf32>
    %310 = vector.extract_strided_slice %11 {offsets = [56, 0], sizes = [8, 128], strides = [1, 1]} : vector<64x128xf32> to vector<8x128xf32>
    %cst_74 = arith.constant dense<0.000000e+00> : vector<8x128xf32>
    %311 = tpu.matmul %287, %2, %cst_74 {dimension_numbers = #tpu.dot_dimension_numbers<[1], [0], [0], [1], [0, 0, 1, 1], [], []>} : vector<8x32xf32>, vector<32x128xf32>, vector<8x128xf32> -> vector<8x128xf32>
    %312 = arith.addf %310, %311 : vector<8x128xf32>
    %cst_75 = arith.constant 5.000000e-01 : f32
    %313 = vector.broadcast %cst_75 : f32 to vector<8x128xf32>
    %314 = arith.mulf %313, %312 : vector<8x128xf32>
    %315 = math.tanh %314 : vector<8x128xf32>
    %cst_76 = arith.constant 5.000000e-01 : f32
    %316 = vector.broadcast %cst_76 : f32 to vector<8x128xf32>
    %317 = arith.mulf %316, %315 : vector<8x128xf32>
    %cst_77 = arith.constant 5.000000e-01 : f32
    %318 = vector.broadcast %cst_77 : f32 to vector<8x128xf32>
    %319 = arith.addf %317, %318 : vector<8x128xf32>
    %320 = math.tanh %312 : vector<8x128xf32>
    %321 = vector.extract_strided_slice %319 {offsets = [0, 0], sizes = [8, 32], strides = [1, 1]} : vector<8x128xf32> to vector<8x32xf32>
    %322 = vector.extract_strided_slice %319 {offsets = [0, 32], sizes = [8, 32], strides = [1, 1]} : vector<8x128xf32> to vector<8x32xf32>
    %323 = vector.extract_strided_slice %320 {offsets = [0, 64], sizes = [8, 32], strides = [1, 1]} : vector<8x128xf32> to vector<8x32xf32>
    %324 = vector.extract_strided_slice %319 {offsets = [0, 96], sizes = [8, 32], strides = [1, 1]} : vector<8x128xf32> to vector<8x32xf32>
    %325 = arith.mulf %322, %285 : vector<8x32xf32>
    %326 = arith.mulf %321, %323 : vector<8x32xf32>
    %327 = arith.addf %325, %326 : vector<8x32xf32>
    %328 = math.tanh %327 : vector<8x32xf32>
    %329 = arith.mulf %324, %328 : vector<8x32xf32>
    %cst_78 = arith.constant dense<0.000000e+00> : vector<8x128xf32>
    %330 = tpu.matmul %329, %4, %cst_78 {dimension_numbers = #tpu.dot_dimension_numbers<[1], [0], [0], [1], [0, 0, 1, 1], [], []>} : vector<8x32xf32>, vector<32x128xf32>, vector<8x128xf32> -> vector<8x128xf32>
    %cst_79 = arith.constant dense<0.000000e+00> : vector<8x128xf32>
    %331 = tpu.matmul %309, %3, %cst_79 {dimension_numbers = #tpu.dot_dimension_numbers<[1], [0], [0], [1], [0, 0, 1, 1], [], []>} : vector<8x32xf32>, vector<32x128xf32>, vector<8x128xf32> -> vector<8x128xf32>
    %332 = arith.addf %330, %331 : vector<8x128xf32>
    %333 = vector.broadcast %5 : vector<1x128xf32> to vector<8x128xf32>
    %334 = arith.addf %332, %333 : vector<8x128xf32>
    %cst_80 = arith.constant 5.000000e-01 : f32
    %335 = vector.broadcast %cst_80 : f32 to vector<8x128xf32>
    %336 = arith.mulf %335, %334 : vector<8x128xf32>
    %337 = math.tanh %336 : vector<8x128xf32>
    %cst_81 = arith.constant 5.000000e-01 : f32
    %338 = vector.broadcast %cst_81 : f32 to vector<8x128xf32>
    %339 = arith.mulf %338, %337 : vector<8x128xf32>
    %cst_82 = arith.constant 5.000000e-01 : f32
    %340 = vector.broadcast %cst_82 : f32 to vector<8x128xf32>
    %341 = arith.addf %339, %340 : vector<8x128xf32>
    %342 = math.tanh %334 : vector<8x128xf32>
    %343 = vector.extract_strided_slice %341 {offsets = [0, 0], sizes = [8, 32], strides = [1, 1]} : vector<8x128xf32> to vector<8x32xf32>
    %344 = vector.extract_strided_slice %341 {offsets = [0, 32], sizes = [8, 32], strides = [1, 1]} : vector<8x128xf32> to vector<8x32xf32>
    %345 = vector.extract_strided_slice %342 {offsets = [0, 64], sizes = [8, 32], strides = [1, 1]} : vector<8x128xf32> to vector<8x32xf32>
    %346 = vector.extract_strided_slice %341 {offsets = [0, 96], sizes = [8, 32], strides = [1, 1]} : vector<8x128xf32> to vector<8x32xf32>
    %347 = arith.mulf %344, %307 : vector<8x32xf32>
    %348 = arith.mulf %343, %345 : vector<8x32xf32>
    %349 = arith.addf %347, %348 : vector<8x32xf32>
    %350 = math.tanh %349 : vector<8x32xf32>
    %351 = arith.mulf %346, %350 : vector<8x32xf32>
    %352 = tpu.concatenate %57, %99, %141, %183, %225, %267, %309, %351 in 0 : vector<8x32xf32>, vector<8x32xf32>, vector<8x32xf32>, vector<8x32xf32>, vector<8x32xf32>, vector<8x32xf32>, vector<8x32xf32>, vector<8x32xf32> -> vector<64x32xf32>
    %c0_83 = arith.constant 0 : index
    %c0_84 = arith.constant 0 : index
    %353 = vector.load %arg2[%c0_83, %c0_84] : memref<40x128xf32, #tpu.memory_space<vmem>>, vector<32x128xf32>
    %c32 = arith.constant 32 : index
    %c0_85 = arith.constant 0 : index
    %354 = vector.load %arg2[%c32, %c0_85] : memref<40x128xf32, #tpu.memory_space<vmem>>, vector<1x128xf32>
    %cst_86 = arith.constant dense<0.000000e+00> : vector<64x128xf32>
    %355 = tpu.matmul %352, %353, %cst_86 {dimension_numbers = #tpu.dot_dimension_numbers<[1], [0], [0], [1], [0, 0, 1, 1], [], []>} : vector<64x32xf32>, vector<32x128xf32>, vector<64x128xf32> -> vector<64x128xf32>
    %356 = vector.broadcast %354 : vector<1x128xf32> to vector<64x128xf32>
    %357 = arith.addf %355, %356 : vector<64x128xf32>
    %c0_87 = arith.constant 0 : index
    %c0_88 = arith.constant 0 : index
    %358 = vector.load %arg3[%c0_87, %c0_88] : memref<64x128xf32, #tpu.memory_space<vmem>>, vector<64x128xf32>
    tpu.vector_store %arg3[%c0_87, %c0_88], %357 {strides = array<i32>} : memref<64x128xf32, #tpu.memory_space<vmem>>, vector<64x128xf32>,
    return
  }
}

</mosaic_0001>

<bundles_post_ra>
// kernel: tpu_custom_call.1
= control target key start
LH: loop header
LB: loop body
LE: loop exit
PB: predicated region body
PF: predicated region fallthrough
CT: control target
= control target key end

     0   :  { %8 = vsyncpa [#allocation3], 0  ;;  %s3610_s0 = inlined_call_operand.vmem [shape: f32[64,1], index: 0, kind: input, shape index: {}]   ;;  %s3611_s1 = inlined_call_operand.hbm [shape: f32[112,128], index: 1, kind: input, shape index: {}]   ;;  %s3612_s2 = inlined_call_operand.vmem [shape: f32[40,128], index: 2, kind: input, shape index: {}]   ;;  %s3613_s3 = inlined_call_operand.hbm [shape: f32[64,128], index: 3, kind: output, shape index: {}]  }
   0x1   :  { %9 = vsyncpa [#allocation4], 0  ;;  %s3152_s12 = smov [#allocation2]   ;;  %s3104_s16 = scalar_lea.hbm %s3611_s1, 1792 }
   0x2   :  { %s17_s13 = sshll.u32 %s3152_s12, 4  ;;  %p3105_p0 = scmp.ne.s32.totalorder %s3611_s1, %s3104_s16  ;;  %s18_s13 = int_to_ptr.vmem [resolvable:$true] %s17_s13 }
   0x3   :  { %p3108_p1 = scmp.lt.u32.totalorder %s3104_s16, %s3611_s1 }
   0x5   :  { %p3110_p2 = pnand %p3108_p1, %p3105_p0 }
   0x7   :  { %3113 = shalt.err (!%p3110_p2)
}
   0x8   :  { %s3114_s21 = scalar_lea.vmem %s18_s13, 1792  ;;  %p3119_p4 = scmp.lt.s32.totalorder %s18_s13, %s18_s13 }
   0x9   :  { %p3115_p3 = scmp.ne.s32.totalorder %s18_s13, %s3114_s21  ;;  %p3120_p5 = scmp.lt.s32.totalorder %s3114_s21, %s3114_s21 }
   0xb   :  { %p3121_p6 = por %p3120_p5, %p3119_p4 }
   0xd   :  { %p3122_p7 = pnand %p3121_p6, %p3115_p3 }
   0xf   :  { %3125 = shalt.err (!%p3122_p7)
}
  0x10   :  { %s3153_s22 = smov 128   ;;  %s3154_s23 = smov 8  }
  0x11   :  { %23 = dma.hbm_to_vmem [thread:$0]  %s3611_s1, 1792, %s18_s13, [#allocation3], %s3153_s22, %s3153_s22, %s3154_s23  }
  0x12   :  { %3148 = dma.done.wait [#allocation3], 1792  }
  0x13   :  { %3149 = vsyncadd [#allocation3], 4294965504  ;;  %v3155_v0 = vmov 0.0|0.0   ;;  %vm3156_vm0 = vmmov 0   ;;  %v3157_v1 = vmov 0.0   ;;  %v3158_v2 = vmov 0  }
  0x14   :  { %2841 = vmatprep.subr.bf16.mxu1 %v3155_v0  ;;  %2565 = vmatprep.mubr.msk.f32.mxu1 %vm3156_vm0, %v3157_v1  ;;  %v31_v3 = vld [vmem:[#allocation2 + $0x28] sm:$0xff]  ;;  %v32_v4 = vld [vmem:[#allocation2 + $0x30] sm:$0xff]  ;;  %v33_v5 = vld [vmem:[#allocation2 + $0x38] sm:$0xff]  ;;  %s3159_s27 = smov 64   ;;  %s3160_s28 = smov 32   ;;  %vm116_vm1 = vcmask 261120  }
  0x15   :  { %3003 = vset.pattern.permute.xlu0 %v3158_v2  ;;  %2853 = vmatprep.subr.bf16.mxu0 %v3155_v0  ;;  %v3203_v6 = vpack.c.bf16 %v32_v4, %v31_v3  ;;  %v34_v7 = vld [vmem:[#allocation2 + $0x40] sm:$0xff]  ;;  %v44_v8 = vld [vmem:[%s3610_s0] sm:$0xff]  ;;  %v3220_v13 = vld [vmem:[#allocation2 + $0x68] ss:$0 sm:$0xff] }
  0x16   :  { %2587 = vmatprep.mubr.msk.f32.mxu0 %vm3156_vm0, %v3157_v1  ;;  %3004 = vset.pattern.permute.xlu1 %v3158_v2  ;;  %v3209_v9 = vpack.c.bf16 %v34_v7, %v33_v5  ;;  %v3217_v11 = vld [vmem:[#allocation2] ss:$0 sm:$0xff]  ;;  %v35_v28 = vld [vmem:[#allocation2 + $0x48] sm:$0xff]  ;;  %v36_v29 = vld [vmem:[#allocation2 + $0x50] sm:$0xff] }
  0x17   :  { %54 = vperm.xlu0 %3003, %v44_v8   ;;  %2843 = vmatpush3.bf16.msra.mxu1 %v3203_v6  ;;  %v37_v30 = vld [vmem:[#allocation2 + $0x58] sm:$0xff]  ;;  %v3228_v31 = vpack.c.bf16 %v36_v29, %v35_v28  ;;  %v38_v32 = vld [vmem:[#allocation2 + $0x60] sm:$0xff]  ;;  %v39_v33 = vld [vmem:[#allocation2 + $0x8] sm:$0xff] }
  0x18   :  { %2844 = vmatprep.subr.bf16.mxu1 %v3155_v0  ;;  %v40_v34 = vld [vmem:[#allocation2 + $0x10] sm:$0xff]  ;;  %v41_v36 = vld [vmem:[#allocation2 + $0x18] sm:$0xff]  ;;  %v42_v37 = vld [vmem:[#allocation2 + $0x20] sm:$0xff]  ;;  %v3233_v38 = vpack.c.bf16 %v38_v32, %v37_v30 }
  0x19   :  { %v3230_v35 = vpack.c.bf16 %v40_v34, %v39_v33  ;;  %v3237_v39 = vpack.c.bf16 %v42_v37, %v41_v36  ;;  %v45_v41 = vld [vmem:[%s3610_s0 + $0x8] sm:$0xff]  ;;  %v3272_v50 = vld [vmem:[#allocation2 + $0x69] ss:$0 sm:$0xff] }
  0x1b   :  { %2846 = vmatpush3.bf16.msra.mxu1 %v3209_v9  ;;  %2855 = vmatpush3.bf16.msra.mxu0 %v3230_v35 }
  0x1c   :  { %2847 = vmatprep.subr.bf16.mxu1 %v3155_v0  ;;  %2856 = vmatprep.subr.bf16.mxu0 %v3155_v0 }
  0x1e   :  { %2566 = vmatmul.mubr.f32.vlgmr.msra.gmra.mrb[0].mxu1 %v3157_v1 }
  0x1f   :  { %2576 = vmatprep.mubr.msk.f32.mxu1 %vm3156_vm0, %v3157_v1  ;;  %2849 = vmatpush3.bf16.msra.mxu1 %v3228_v31 }
  0x20   :  { %2850 = vmatprep.subr.bf16.mxu1 %v3155_v0  ;;  %2858 = vmatpush3.bf16.msra.mxu0 %v3237_v39 }
  0x21   :  { %2865 = vmatprep.subr.bf16.mxu0 %v3155_v0 }
  0x23   :  { %2852 = vmatpush3.bf16.msra.mxu1 %v3233_v38 }
  0x24   :  { %2859 = vmatprep.subr.bf16.mxu1 %v3155_v0 }
  0x26   :  { %2577 = vmatmul.mubr.f32.vlgmr.msra.gmra.mrb[2].mxu1 %v3157_v1 }
  0x27   :  { %2861 = vmatpush3.bf16.msra.mxu1 %v3203_v6  ;;  %2598 = vmatprep.mubr.msk.f32.mxu1 %vm3156_vm0, %v3157_v1 }
  0x28   :  { %2862 = vmatprep.subr.bf16.mxu1 %v3155_v0 }
  0x2b   :  { %2864 = vmatpush3.bf16.msra.mxu1 %v3209_v9 }
  0x2c   :  { %2871 = vmatprep.subr.bf16.mxu1 %v3155_v0 }
  0x96   :  { %v55_v10 = vpop.permute.xlu0 %54 }
  0x97   :  { %v96_v12 = vmul.f32 %v3217_v11, %v55_v10 }
  0x99   :  { %v108_v14 = vadd.f32 %v3220_v13, %v96_v12 }
  0xf1   :  { %v186_v15 = vpop.f32.mrb[0].mxu1 }
  0xf2   :  { %v190_v16 = vadd.f32 %v186_v15, %v108_v14  ;;  %v2567_v17 = vpop.f32.mrb[1].mxu1 }
  0xf4   :  { %3005 = vtanh.f32 %v190_v16  ;;  %v191_v19 = vmul.f32 0.5, %v190_v16 }
  0xf6   :  { %3007 = vtanh.f32 %v191_v19 }
  0xf9   :  { %v279_v44 = vpop.f32.mrb[2].mxu1 }
  0xfa   :  { %v2578_v45 = vpop.f32.mrb[3].mxu1 }
  0xfe   :  { %v3006_v18 = vpop.eup %3005 }
  0xff   :  { %198 = vrot.lane.b32.xlu0 %v3006_v18, %s3159_s27 }
 0x100   :  { %v3008_v20 = vpop.eup %3007 }
 0x101   :  { %v193_v21 = vmul.f32 0.5, %v3008_v20 }
 0x103   :  { %v194_v22 = vadd.f32 0.5, %v193_v21 }
 0x105   :  { %v196_v25 = vmul.f32 0.0, %v194_v22 }
 0x171   :  { %v199_v23 = vpop.permute.xlu0 %198 }
 0x172   :  { %v201_v24 = vmul.f32 %v199_v23, %v194_v22 }
 0x174   :  { %203 = vrot.lane.b32.xlu1 %v201_v24, %s3160_s28 }
 0x1e6   :  { %v204_v26 = vpop.permute.xlu1 %203 }
 0x1e7   :  { %v3225_v27 = vadd.f32 %v204_v26, %v196_v25  ;;  %v46_v26 = vld [vmem:[%s3610_s0 + $0x10] sm:$0xff] }
 0x1e9   :  { %3009 = vtanh.f32 %v3225_v27 }
 0x1f3   :  { %v3010_v40 = vpop.eup %3009 }
 0x1f4   :  { %209 = vrot.lane.b32.xlu1 %v3010_v40, %s3159_s27 }
 0x1f8   :  { %59 = vperm.xlu1 %3004, %v45_v41  }
 0x266   :  { %v210_v42 = vpop.permute.xlu1 %209 }
 0x267   :  { %v212_v43 = vmul.f32 %v210_v42, %v194_v22 }
 0x269   :  { %284 = vrot.lane.b32.xlu0 %v212_v43, %s3160_s28 }
 0x277   :  { %v60_v47 = vpop.permute.xlu1 %59 }
 0x278   :  { %v97_v48 = vmul.f32 %v3217_v11, %v60_v47 }
 0x27a   :  { %v109_v49 = vadd.f32 %v3220_v13, %v97_v48 }
 0x2db   :  { %v285_v46 = vpop.permute.xlu0 %284 }
 0x2dc   :  { %2588 = vmatmul.mubr.msk.f32.vlgmr.msra.gmra.mrb[0].mxu0 %vm116_vm1, %v285_v46  ;;  %2599 = vmatmul.mubr.msk.f32.vlgmr.msra.gmra.mrb[4].mxu1 %vm116_vm1, %v285_v46 }
 0x2dd   :  { %2873 = vmatpush3.bf16.msra.mxu1 %v3230_v35  ;;  %2867 = vmatpush3.bf16.msra.mxu0 %v3228_v31 }
 0x2de   :  { %2874 = vmatprep.subr.bf16.mxu1 %v3155_v0  ;;  %2868 = vmatprep.subr.bf16.mxu0 %v3155_v0 }
 0x2df   :  { %2620 = vmatprep.mubr.msk.f32.mxu1 %vm3156_vm0, %v3157_v1  ;;  %2609 = vmatprep.mubr.msk.f32.mxu0 %vm3156_vm0, %v3157_v1 }
 0x2e1   :  { %2876 = vmatpush3.bf16.msra.mxu1 %v3237_v39  ;;  %2870 = vmatpush3.bf16.msra.mxu0 %v3233_v38 }
 0x2e2   :  { %2877 = vmatprep.subr.bf16.mxu0 %v3155_v0  ;;  %2883 = vmatprep.subr.bf16.mxu1 %v3155_v0 }
 0x3af   :  { %v354_v51 = vpop.f32.mrb[0].mxu0  ;;  %v451_v52 = vpop.f32.mrb[4].mxu1 }
 0x3b0   :  { %v355_v53 = vadd.f32 %v354_v51, %v279_v44  ;;  %v455_v54 = vadd.f32 %v451_v52, %v109_v49  ;;  %v2589_v55 = vpop.f32.mrb[1].mxu0  ;;  %v2600_v56 = vpop.f32.mrb[5].mxu1 }
 0x3b2   :  { %v362_v57 = vadd.f32 %v3272_v50, %v355_v53  ;;  %3011 = vtanh.f32 %v455_v54  ;;  %v456_v60 = vmul.f32 0.5, %v455_v54 }
 0x3b4   :  { %3013 = vtanh.f32 %v362_v57  ;;  %v363_v61 = vmul.f32 0.5, %v362_v57 }
 0x3b5   :  { %3015 = vtanh.f32 %v456_v60 }
 0x3b6   :  { %3017 = vtanh.f32 %v363_v61 }
 0x3bc   :  { %v3012_v58 = vpop.eup %3011 }
 0x3bd   :  { %463 = vrot.lane.b32.xlu1 %v3012_v58, %s3159_s27 }
 0x3be   :  { %v3014_v59 = vpop.eup %3013 }
 0x3bf   :  { %370 = vrot.lane.b32.xlu0 %v3014_v59, %s3159_s27  ;;  %v3016_v62 = vpop.eup %3015 }
 0x3c0   :  { %v3018_v63 = vpop.eup %3017  ;;  %v458_v2 = vmul.f32 0.5, %v3016_v62 }
 0x3c1   :  { %v365_v3 = vmul.f32 0.5, %v3018_v63 }
 0x3c2   :  { %v459_v4 = vadd.f32 0.5, %v458_v2 }
 0x3c3   :  { %v366_v8 = vadd.f32 0.5, %v365_v3 }
 0x3c4   :  { %v461_v14 = vmul.f32 %v459_v4, %v3225_v27 }
 0x3c5   :  { %v368_v17 = vmul.f32 0.0, %v366_v8 }
 0x42f   :  { %v464_v5 = vpop.permute.xlu1 %463 }
 0x430   :  { %v466_v7 = vmul.f32 %v464_v5, %v459_v4 }
 0x431   :  { %v371_v10 = vpop.permute.xlu0 %370 }
 0x432   :  { %v373_v12 = vmul.f32 %v371_v10, %v366_v8  ;;  %468 = vrot.lane.b32.xlu1 %v466_v7, %s3160_s28  ;;  %v47_v10 = vld [vmem:[%s3610_s0 + $0x18] sm:$0xff] }
 0x434   :  { %375 = vrot.lane.b32.xlu0 %v373_v12, %s3160_s28 }
 0x4a4   :  { %v469_v15 = vpop.permute.xlu1 %468 }
 0x4a5   :  { %v3280_v16 = vadd.f32 %v469_v15, %v461_v14 }
 0x4a6   :  { %v376_v18 = vpop.permute.xlu0 %375 }
 0x4a7   :  { %3019 = vtanh.f32 %v3280_v16  ;;  %v3283_v19 = vadd.f32 %v376_v18, %v368_v17 }
 0x4a9   :  { %3021 = vtanh.f32 %v3283_v19 }
 0x4b1   :  { %v3020_v20 = vpop.eup %3019 }
 0x4b2   :  { %474 = vrot.lane.b32.xlu1 %v3020_v20, %s3159_s27 }
 0x4b3   :  { %v3022_v21 = vpop.eup %3021 }
 0x4b4   :  { %381 = vrot.lane.b32.xlu0 %v3022_v21, %s3159_s27 }
 0x524   :  { %v475_v22 = vpop.permute.xlu1 %474 }
 0x525   :  { %v477_v23 = vmul.f32 %v475_v22, %v459_v4 }
 0x526   :  { %v382_v24 = vpop.permute.xlu0 %381 }
 0x527   :  { %v384_v25 = vmul.f32 %v382_v24, %v366_v8  ;;  %554 = vrot.lane.b32.xlu1 %v477_v23, %s3160_s28 }
 0x529   :  { %479 = vrot.lane.b32.xlu0 %v384_v25, %s3160_s28 }
 0x52d   :  { %64 = vperm.xlu0 %3003, %v46_v26  }
 0x599   :  { %v555_v27 = vpop.permute.xlu1 %554 }
 0x59a   :  { %2621 = vmatmul.mubr.msk.f32.vlgmr.msra.gmra.mrb[6].mxu1 %vm116_vm1, %v555_v27 }
 0x59b   :  { %v3294_v28 = vpop.permute.xlu0 %479  ;;  %2885 = vmatpush3.bf16.msra.mxu1 %v3228_v31  ;;  %2642 = vmatprep.mubr.msk.f32.mxu1 %vm3156_vm0, %v3157_v1 }
 0x59c   :  { %2610 = vmatmul.mubr.msk.f32.vlgmr.msra.gmra.mrb[2].mxu0 %vm116_vm1, %v3294_v28  ;;  %2886 = vmatprep.subr.bf16.mxu1 %v3155_v0 }
 0x59d   :  { %2879 = vmatpush3.bf16.msra.mxu0 %v3203_v6  ;;  %2631 = vmatprep.mubr.msk.f32.mxu0 %vm3156_vm0, %v3157_v1 }
 0x59e   :  { %2880 = vmatprep.subr.bf16.mxu0 %v3155_v0 }
 0x59f   :  { %2888 = vmatpush3.bf16.msra.mxu1 %v3233_v38 }
 0x5a0   :  { %2895 = vmatprep.subr.bf16.mxu1 %v3155_v0 }
 0x5a1   :  { %2882 = vmatpush3.bf16.msra.mxu0 %v3209_v9 }
 0x5a2   :  { %2889 = vmatprep.subr.bf16.mxu0 %v3155_v0 }
 0x5a4   :  { %2632 = vmatmul.mubr.msk.f32.vlgmr.msra.gmra.mrb[4].mxu0 %vm116_vm1, %v555_v27 }
 0x5a5   :  { %2891 = vmatpush3.bf16.msra.mxu0 %v3230_v35  ;;  %2653 = vmatprep.mubr.msk.f32.mxu0 %vm3156_vm0, %v3157_v1 }
 0x5a6   :  { %2892 = vmatprep.subr.bf16.mxu0 %v3155_v0 }
 0x5a9   :  { %2894 = vmatpush3.bf16.msra.mxu0 %v3237_v39 }
 0x5aa   :  { %2901 = vmatprep.subr.bf16.mxu0 %v3155_v0 }
 0x5ac   :  { %v65_v32 = vpop.permute.xlu0 %64 }
 0x5ad   :  { %v98_v37 = vmul.f32 %v3217_v11, %v65_v32 }
 0x5af   :  { %v110_v41 = vadd.f32 %v3220_v13, %v98_v37 }
 0x66d   :  { %v624_v29 = vpop.f32.mrb[6].mxu1 }
 0x66e   :  { %v2622_v30 = vpop.f32.mrb[7].mxu1 }
 0x66f   :  { %v549_v33 = vpop.f32.mrb[2].mxu0 }
 0x670   :  { %v625_v34 = vadd.f32 %v624_v29, %v549_v33  ;;  %v2611_v36 = vpop.f32.mrb[3].mxu0 }
 0x672   :  { %v628_v40 = vadd.f32 %v3272_v50, %v625_v34 }
 0x674   :  { %3023 = vtanh.f32 %v628_v40  ;;  %v629_v47 = vmul.f32 0.5, %v628_v40 }
 0x677   :  { %v717_v42 = vpop.f32.mrb[4].mxu0 }
 0x678   :  { %v721_v43 = vadd.f32 %v717_v42, %v110_v41  ;;  %v2633_v44 = vpop.f32.mrb[5].mxu0 }
 0x67a   :  { %3025 = vtanh.f32 %v721_v43  ;;  %v722_v48 = vmul.f32 0.5, %v721_v43 }
 0x67b   :  { %3027 = vtanh.f32 %v629_v47 }
 0x67c   :  { %3029 = vtanh.f32 %v722_v48 }
 0x67e   :  { %v3024_v45 = vpop.eup %3023 }
 0x67f   :  { %636 = vrot.lane.b32.xlu1 %v3024_v45, %s3159_s27 }
 0x684   :  { %v3026_v46 = vpop.eup %3025 }
 0x685   :  { %729 = vrot.lane.b32.xlu0 %v3026_v46, %s3159_s27  ;;  %v3028_v49 = vpop.eup %3027 }
 0x686   :  { %v631_v51 = vmul.f32 0.5, %v3028_v49  ;;  %v3030_v52 = vpop.eup %3029 }
 0x687   :  { %v724_v56 = vmul.f32 0.5, %v3030_v52 }
 0x688   :  { %v632_v53 = vadd.f32 0.5, %v631_v51 }
 0x689   :  { %v725_v57 = vadd.f32 0.5, %v724_v56 }
 0x68a   :  { %v634_v60 = vmul.f32 %v632_v53, %v3283_v19 }
 0x68b   :  { %v727_v63 = vmul.f32 %v725_v57, %v3280_v16 }
 0x6f1   :  { %v637_v54 = vpop.permute.xlu1 %636 }
 0x6f2   :  { %v639_v55 = vmul.f32 %v637_v54, %v632_v53 }
 0x6f4   :  { %641 = vrot.lane.b32.xlu1 %v639_v55, %s3160_s28 }
 0x6f7   :  { %v730_v58 = vpop.permute.xlu0 %729 }
 0x6f8   :  { %v732_v59 = vmul.f32 %v730_v58, %v725_v57 }
 0x6fa   :  { %734 = vrot.lane.b32.xlu0 %v732_v59, %s3160_s28 }
 0x766   :  { %v642_v61 = vpop.permute.xlu1 %641 }
 0x767   :  { %v3325_v62 = vadd.f32 %v642_v61, %v634_v60  ;;  %v48_v61 = vld [vmem:[%s3610_s0 + $0x20] sm:$0xff] }
 0x769   :  { %3031 = vtanh.f32 %v3325_v62 }
 0x76c   :  { %v735_v2 = vpop.permute.xlu0 %734 }
 0x76d   :  { %v3329_v3 = vadd.f32 %v735_v2, %v727_v63 }
 0x76f   :  { %3033 = vtanh.f32 %v3329_v3 }
 0x773   :  { %v3032_v4 = vpop.eup %3031 }
 0x774   :  { %647 = vrot.lane.b32.xlu1 %v3032_v4, %s3159_s27 }
 0x779   :  { %v3034_v5 = vpop.eup %3033 }
 0x77a   :  { %740 = vrot.lane.b32.xlu0 %v3034_v5, %s3159_s27 }
 0x7e6   :  { %v648_v7 = vpop.permute.xlu1 %647 }
 0x7e7   :  { %v650_v8 = vmul.f32 %v648_v7, %v632_v53 }
 0x7e9   :  { %745 = vrot.lane.b32.xlu1 %v650_v8, %s3160_s28 }
 0x7ec   :  { %v741_v12 = vpop.permute.xlu0 %740 }
 0x7ed   :  { %v743_v14 = vmul.f32 %v741_v12, %v725_v57  ;;  %69 = vperm.xlu1 %3004, %v47_v10  }
 0x7ef   :  { %820 = vrot.lane.b32.xlu0 %v743_v14, %s3160_s28 }
 0x85b   :  { %v3339_v15 = vpop.permute.xlu1 %745 }
 0x85c   :  { %2643 = vmatmul.mubr.msk.f32.vlgmr.msra.gmra.mrb[8].mxu1 %vm116_vm1, %v3339_v15 }
 0x85d   :  { %2897 = vmatpush3.bf16.msra.mxu1 %v3203_v6  ;;  %2664 = vmatprep.mubr.msk.f32.mxu1 %vm3156_vm0, %v3157_v1 }
 0x85e   :  { %2898 = vmatprep.subr.bf16.mxu1 %v3155_v0 }
 0x861   :  { %v821_v16 = vpop.permute.xlu0 %820  ;;  %2900 = vmatpush3.bf16.msra.mxu1 %v3209_v9 }
 0x862   :  { %2654 = vmatmul.mubr.msk.f32.vlgmr.msra.gmra.mrb[6].mxu0 %vm116_vm1, %v821_v16  ;;  %2907 = vmatprep.subr.bf16.mxu1 %v3155_v0 }
 0x863   :  { %2903 = vmatpush3.bf16.msra.mxu0 %v3228_v31  ;;  %2675 = vmatprep.mubr.msk.f32.mxu0 %vm3156_vm0, %v3157_v1 }
 0x864   :  { %2665 = vmatmul.mubr.msk.f32.vlgmr.msra.gmra.mrb[10].mxu1 %vm116_vm1, %v821_v16  ;;  %2904 = vmatprep.subr.bf16.mxu0 %v3155_v0 }
 0x865   :  { %2909 = vmatpush3.bf16.msra.mxu1 %v3230_v35  ;;  %2686 = vmatprep.mubr.msk.f32.mxu1 %vm3156_vm0, %v3157_v1 }
 0x866   :  { %2910 = vmatprep.subr.bf16.mxu1 %v3155_v0 }
 0x867   :  { %2906 = vmatpush3.bf16.msra.mxu0 %v3233_v38 }
 0x868   :  { %2913 = vmatprep.subr.bf16.mxu0 %v3155_v0 }
 0x869   :  { %2912 = vmatpush3.bf16.msra.mxu1 %v3237_v39 }
 0x86a   :  { %2919 = vmatprep.subr.bf16.mxu1 %v3155_v0 }
 0x86c   :  { %v70_v17 = vpop.permute.xlu1 %69 }
 0x86d   :  { %v99_v20 = vmul.f32 %v3217_v11, %v70_v17 }
 0x86f   :  { %v111_v24 = vadd.f32 %v3220_v13, %v99_v20 }
 0x92f   :  { %v815_v18 = vpop.f32.mrb[8].mxu1 }
 0x930   :  { %v2644_v19 = vpop.f32.mrb[9].mxu1 }
 0x935   :  { %v890_v21 = vpop.f32.mrb[6].mxu0 }
 0x936   :  { %v891_v22 = vadd.f32 %v890_v21, %v815_v18  ;;  %v2655_v23 = vpop.f32.mrb[7].mxu0 }
 0x937   :  { %v983_v25 = vpop.f32.mrb[10].mxu1 }
 0x938   :  { %v894_v26 = vadd.f32 %v3272_v50, %v891_v22  ;;  %v987_v27 = vadd.f32 %v983_v25, %v111_v24  ;;  %v2666_v29 = vpop.f32.mrb[11].mxu1 }
 0x93a   :  { %3035 = vtanh.f32 %v894_v26  ;;  %v895_v33 = vmul.f32 0.5, %v894_v26  ;;  %v988_v34 = vmul.f32 0.5, %v987_v27 }
 0x93b   :  { %3037 = vtanh.f32 %v987_v27 }
 0x93c   :  { %3039 = vtanh.f32 %v895_v33 }
 0x93d   :  { %3041 = vtanh.f32 %v988_v34 }
 0x944   :  { %v3036_v30 = vpop.eup %3035 }
 0x945   :  { %v3038_v32 = vpop.eup %3037  ;;  %902 = vrot.lane.b32.xlu0 %v3036_v30, %s3159_s27 }
 0x946   :  { %995 = vrot.lane.b32.xlu1 %v3038_v32, %s3159_s27  ;;  %v3040_v36 = vpop.eup %3039 }
 0x947   :  { %v3042_v37 = vpop.eup %3041  ;;  %v897_v40 = vmul.f32 0.5, %v3040_v36 }
 0x948   :  { %v990_v41 = vmul.f32 0.5, %v3042_v37 }
 0x949   :  { %v898_v42 = vadd.f32 0.5, %v897_v40 }
 0x94a   :  { %v991_v44 = vadd.f32 0.5, %v990_v41 }
 0x94b   :  { %v900_v48 = vmul.f32 %v898_v42, %v3325_v62 }
 0x94c   :  { %v993_v51 = vmul.f32 %v991_v44, %v3329_v3 }
 0x9b7   :  { %v903_v43 = vpop.permute.xlu0 %902 }
 0x9b8   :  { %v905_v45 = vmul.f32 %v903_v43, %v898_v42  ;;  %v996_v46 = vpop.permute.xlu1 %995 }
 0x9b9   :  { %v998_v47 = vmul.f32 %v996_v46, %v991_v44 }
 0x9ba   :  { %907 = vrot.lane.b32.xlu0 %v905_v45, %s3160_s28 }
 0x9bb   :  { %1000 = vrot.lane.b32.xlu1 %v998_v47, %s3160_s28 }
 0xa2c   :  { %v908_v49 = vpop.permute.xlu0 %907 }
 0xa2d   :  { %v3372_v52 = vadd.f32 %v908_v49, %v900_v48  ;;  %v1001_v53 = vpop.permute.xlu1 %1000  ;;  %v49_v48 = vld [vmem:[%s3610_s0 + $0x28] sm:$0xff] }
 0xa2e   :  { %v3374_v54 = vadd.f32 %v1001_v53, %v993_v51 }
 0xa2f   :  { %3043 = vtanh.f32 %v3372_v52 }
 0xa30   :  { %3045 = vtanh.f32 %v3374_v54 }
 0xa39   :  { %v3044_v55 = vpop.eup %3043 }
 0xa3a   :  { %v3046_v56 = vpop.eup %3045  ;;  %913 = vrot.lane.b32.xlu0 %v3044_v55, %s3159_s27 }
 0xa3b   :  { %1006 = vrot.lane.b32.xlu1 %v3046_v56, %s3159_s27 }
 0xaac   :  { %v914_v57 = vpop.permute.xlu0 %913 }
 0xaad   :  { %v916_v58 = vmul.f32 %v914_v57, %v898_v42  ;;  %v1007_v59 = vpop.permute.xlu1 %1006 }
 0xaae   :  { %v1009_v60 = vmul.f32 %v1007_v59, %v991_v44 }
 0xaaf   :  { %1011 = vrot.lane.b32.xlu0 %v916_v58, %s3160_s28 }
 0xab0   :  { %1086 = vrot.lane.b32.xlu1 %v1009_v60, %s3160_s28 }
 0xab3   :  { %74 = vperm.xlu0 %3003, %v48_v61  }
 0xb21   :  { %v3385_v62 = vpop.permute.xlu0 %1011 }
 0xb22   :  { %v1087_v63 = vpop.permute.xlu1 %1086  ;;  %2676 = vmatmul.mubr.msk.f32.vlgmr.msra.gmra.mrb[8].mxu0 %vm116_vm1, %v3385_v62 }
 0xb23   :  { %2687 = vmatmul.mubr.msk.f32.vlgmr.msra.gmra.mrb[12].mxu1 %vm116_vm1, %v1087_v63  ;;  %2915 = vmatpush3.bf16.msra.mxu0 %v3203_v6 }
 0xb24   :  { %2916 = vmatprep.subr.bf16.mxu0 %v3155_v0  ;;  %2697 = vmatprep.mubr.msk.f32.mxu0 %vm3156_vm0, %v3157_v1 }
 0xb25   :  { %2921 = vmatpush3.bf16.msra.mxu1 %v3228_v31  ;;  %2708 = vmatprep.mubr.msk.f32.mxu1 %vm3156_vm0, %v3157_v1 }
 0xb26   :  { %2922 = vmatprep.subr.bf16.mxu1 %v3155_v0 }
 0xb27   :  { %2918 = vmatpush3.bf16.msra.mxu0 %v3209_v9 }
 0xb28   :  { %2925 = vmatprep.subr.bf16.mxu0 %v3155_v0 }
 0xb29   :  { %2924 = vmatpush3.bf16.msra.mxu1 %v3233_v38 }
 0xb2a   :  { %2698 = vmatmul.mubr.msk.f32.vlgmr.msra.gmra.mrb[10].mxu0 %vm116_vm1, %v1087_v63  ;;  %2931 = vmatprep.subr.bf16.mxu1 %v3155_v0 }
 0xb2b   :  { %2927 = vmatpush3.bf16.msra.mxu0 %v3230_v35  ;;  %2719 = vmatprep.mubr.msk.f32.mxu0 %vm3156_vm0, %v3157_v1 }
 0xb2c   :  { %2928 = vmatprep.subr.bf16.mxu0 %v3155_v0 }
 0xb2f   :  { %2930 = vmatpush3.bf16.msra.mxu0 %v3237_v39 }
 0xb30   :  { %2937 = vmatprep.subr.bf16.mxu0 %v3155_v0 }
 0xb32   :  { %v75_v2 = vpop.permute.xlu0 %74 }
 0xb33   :  { %v100_v10 = vmul.f32 %v3217_v11, %v75_v2 }
 0xb35   :  { %v112_v14 = vadd.f32 %v3220_v13, %v100_v10 }
 0xbf5   :  { %v1081_v3 = vpop.f32.mrb[8].mxu0 }
 0xbf6   :  { %v1156_v4 = vpop.f32.mrb[12].mxu1  ;;  %v2677_v5 = vpop.f32.mrb[9].mxu0 }
 0xbf7   :  { %v1157_v7 = vadd.f32 %v1156_v4, %v1081_v3  ;;  %v2688_v8 = vpop.f32.mrb[13].mxu1 }
 0xbf9   :  { %v1160_v12 = vadd.f32 %v3272_v50, %v1157_v7 }
 0xbfb   :  { %3047 = vtanh.f32 %v1160_v12  ;;  %v1161_v21 = vmul.f32 0.5, %v1160_v12 }
 0xbfd   :  { %v1249_v16 = vpop.f32.mrb[10].mxu0 }
 0xbfe   :  { %v1253_v17 = vadd.f32 %v1249_v16, %v112_v14  ;;  %v2699_v18 = vpop.f32.mrb[11].mxu0 }
 0xc00   :  { %3049 = vtanh.f32 %v1253_v17  ;;  %v1254_v22 = vmul.f32 0.5, %v1253_v17 }
 0xc01   :  { %3051 = vtanh.f32 %v1161_v21 }
 0xc02   :  { %3053 = vtanh.f32 %v1254_v22 }
 0xc05   :  { %v3048_v19 = vpop.eup %3047 }
 0xc06   :  { %1168 = vrot.lane.b32.xlu1 %v3048_v19, %s3159_s27 }
 0xc0a   :  { %v3050_v20 = vpop.eup %3049 }
 0xc0b   :  { %1261 = vrot.lane.b32.xlu0 %v3050_v20, %s3159_s27  ;;  %v3052_v23 = vpop.eup %3051 }
 0xc0c   :  { %v1163_v24 = vmul.f32 0.5, %v3052_v23  ;;  %v3054_v25 = vpop.eup %3053 }
 0xc0d   :  { %v1256_v29 = vmul.f32 0.5, %v3054_v25 }
 0xc0e   :  { %v1164_v26 = vadd.f32 0.5, %v1163_v24 }
 0xc0f   :  { %v1257_v32 = vadd.f32 0.5, %v1256_v29 }
 0xc10   :  { %v1166_v36 = vmul.f32 %v1164_v26, %v3372_v52 }
 0xc11   :  { %v1259_v41 = vmul.f32 %v1257_v32, %v3374_v54 }
 0xc78   :  { %v1169_v27 = vpop.permute.xlu1 %1168 }
 0xc79   :  { %v1171_v30 = vmul.f32 %v1169_v27, %v1164_v26 }
 0xc7b   :  { %1173 = vrot.lane.b32.xlu1 %v1171_v30, %s3160_s28 }
 0xc7d   :  { %v1262_v33 = vpop.permute.xlu0 %1261 }
 0xc7e   :  { %v1264_v34 = vmul.f32 %v1262_v33, %v1257_v32 }
 0xc80   :  { %1266 = vrot.lane.b32.xlu0 %v1264_v34, %s3160_s28 }
 0xced   :  { %v1174_v37 = vpop.permute.xlu1 %1173 }
 0xcee   :  { %v3417_v40 = vadd.f32 %v1174_v37, %v1166_v36 }
 0xcf0   :  { %3055 = vtanh.f32 %v3417_v40 }
 0xcf2   :  { %v1267_v42 = vpop.permute.xlu0 %1266 }
 0xcf3   :  { %v3421_v43 = vadd.f32 %v1267_v42, %v1259_v41  ;;  %v50_v41 = vld [vmem:[%s3610_s0 + $0x30] sm:$0xff] }
 0xcf5   :  { %3057 = vtanh.f32 %v3421_v43 }
 0xcfa   :  { %v3056_v44 = vpop.eup %3055 }
 0xcfb   :  { %1179 = vrot.lane.b32.xlu1 %v3056_v44, %s3159_s27 }
 0xcff   :  { %v3058_v45 = vpop.eup %3057 }
 0xd00   :  { %1272 = vrot.lane.b32.xlu0 %v3058_v45, %s3159_s27 }
 0xd6d   :  { %v1180_v46 = vpop.permute.xlu1 %1179 }
 0xd6e   :  { %v1182_v47 = vmul.f32 %v1180_v46, %v1164_v26 }
 0xd70   :  { %1277 = vrot.lane.b32.xlu1 %v1182_v47, %s3160_s28 }
 0xd72   :  { %v1273_v49 = vpop.permute.xlu0 %1272 }
 0xd73   :  { %v1275_v51 = vmul.f32 %v1273_v49, %v1257_v32 }
 0xd74   :  { %79 = vperm.xlu1 %3004, %v49_v48  }
 0xd75   :  { %1352 = vrot.lane.b32.xlu0 %v1275_v51, %s3160_s28 }
 0xde2   :  { %v3431_v52 = vpop.permute.xlu1 %1277 }
 0xde3   :  { %2709 = vmatmul.mubr.msk.f32.vlgmr.msra.gmra.mrb[14].mxu1 %vm116_vm1, %v3431_v52 }
 0xde4   :  { %2933 = vmatpush3.bf16.msra.mxu1 %v3203_v6  ;;  %2730 = vmatprep.mubr.msk.f32.mxu1 %vm3156_vm0, %v3157_v1 }
 0xde5   :  { %2934 = vmatprep.subr.bf16.mxu1 %v3155_v0 }
 0xde7   :  { %v1353_v53 = vpop.permute.xlu0 %1352 }
 0xde8   :  { %2936 = vmatpush3.bf16.msra.mxu1 %v3209_v9  ;;  %2720 = vmatmul.mubr.msk.f32.vlgmr.msra.gmra.mrb[12].mxu0 %vm116_vm1, %v1353_v53 }
 0xde9   :  { %2939 = vmatpush3.bf16.msra.mxu0 %v3228_v31  ;;  %2943 = vmatprep.subr.bf16.mxu1 %v3155_v0 }
 0xdea   :  { %2940 = vmatprep.subr.bf16.mxu0 %v3155_v0  ;;  %2741 = vmatprep.mubr.msk.f32.mxu0 %vm3156_vm0, %v3157_v1 }
 0xdeb   :  { %2731 = vmatmul.mubr.msk.f32.vlgmr.msra.gmra.mrb[16].mxu1 %vm116_vm1, %v1353_v53 }
 0xdec   :  { %2945 = vmatpush3.bf16.msra.mxu1 %v3230_v35  ;;  %2752 = vmatprep.mubr.msk.f32.mxu1 %vm3156_vm0, %v3157_v1 }
 0xded   :  { %2942 = vmatpush3.bf16.msra.mxu0 %v3233_v38  ;;  %2946 = vmatprep.subr.bf16.mxu1 %v3155_v0 }
 0xdee   :  { %2949 = vmatprep.subr.bf16.mxu0 %v3155_v0 }
 0xdf0   :  { %2948 = vmatpush3.bf16.msra.mxu1 %v3237_v39 }
 0xdf1   :  { %2955 = vmatprep.subr.bf16.mxu1 %v3155_v0 }
 0xdf3   :  { %v80_v54 = vpop.permute.xlu1 %79 }
 0xdf4   :  { %v101_v57 = vmul.f32 %v3217_v11, %v80_v54 }
 0xdf6   :  { %v113_v61 = vadd.f32 %v3220_v13, %v101_v57 }
 0xeb6   :  { %v1347_v55 = vpop.f32.mrb[14].mxu1 }
 0xeb7   :  { %v2710_v56 = vpop.f32.mrb[15].mxu1 }
 0xebb   :  { %v1422_v58 = vpop.f32.mrb[12].mxu0 }
 0xebc   :  { %v1423_v59 = vadd.f32 %v1422_v58, %v1347_v55  ;;  %v2721_v60 = vpop.f32.mrb[13].mxu0 }
 0xebe   :  { %v1426_v63 = vadd.f32 %v3272_v50, %v1423_v59  ;;  %v1515_v2 = vpop.f32.mrb[16].mxu1 }
 0xebf   :  { %v1519_v3 = vadd.f32 %v1515_v2, %v113_v61  ;;  %v2732_v4 = vpop.f32.mrb[17].mxu1 }
 0xec0   :  { %3059 = vtanh.f32 %v1426_v63  ;;  %v1427_v8 = vmul.f32 0.5, %v1426_v63 }
 0xec1   :  { %3061 = vtanh.f32 %v1519_v3  ;;  %v1520_v10 = vmul.f32 0.5, %v1519_v3 }
 0xec2   :  { %3063 = vtanh.f32 %v1427_v8 }
 0xec3   :  { %3065 = vtanh.f32 %v1520_v10 }
 0xeca   :  { %v3060_v5 = vpop.eup %3059 }
 0xecb   :  { %v3062_v7 = vpop.eup %3061  ;;  %1434 = vrot.lane.b32.xlu0 %v3060_v5, %s3159_s27 }
 0xecc   :  { %1527 = vrot.lane.b32.xlu1 %v3062_v7, %s3159_s27  ;;  %v3064_v12 = vpop.eup %3063 }
 0xecd   :  { %v3066_v14 = vpop.eup %3065  ;;  %v1429_v16 = vmul.f32 0.5, %v3064_v12 }
 0xece   :  { %v1522_v17 = vmul.f32 0.5, %v3066_v14 }
 0xecf   :  { %v1430_v18 = vadd.f32 0.5, %v1429_v16 }
 0xed0   :  { %v1523_v20 = vadd.f32 0.5, %v1522_v17 }
 0xed1   :  { %v1432_v24 = vmul.f32 %v1430_v18, %v3417_v40 }
 0xed2   :  { %v1525_v26 = vmul.f32 %v1523_v20, %v3421_v43 }
 0xf3d   :  { %v1435_v19 = vpop.permute.xlu0 %1434 }
 0xf3e   :  { %v1437_v21 = vmul.f32 %v1435_v19, %v1430_v18  ;;  %v1528_v22 = vpop.permute.xlu1 %1527 }
 0xf3f   :  { %v1530_v23 = vmul.f32 %v1528_v22, %v1523_v20 }
 0xf40   :  { %1439 = vrot.lane.b32.xlu0 %v1437_v21, %s3160_s28 }
 0xf41   :  { %1532 = vrot.lane.b32.xlu1 %v1530_v23, %s3160_s28 }
 0xfb2   :  { %v1440_v25 = vpop.permute.xlu0 %1439 }
 0xfb3   :  { %v3464_v27 = vadd.f32 %v1440_v25, %v1432_v24  ;;  %v1533_v29 = vpop.permute.xlu1 %1532  ;;  %v51_v24 = vld [vmem:[%s3610_s0 + $0x38] sm:$0xff] }
 0xfb4   :  { %v3466_v30 = vadd.f32 %v1533_v29, %v1525_v26 }
 0xfb5   :  { %3067 = vtanh.f32 %v3464_v27 }
 0xfb6   :  { %3069 = vtanh.f32 %v3466_v30 }
 0xfbf   :  { %v3068_v32 = vpop.eup %3067 }
 0xfc0   :  { %v3070_v33 = vpop.eup %3069  ;;  %1445 = vrot.lane.b32.xlu0 %v3068_v32, %s3159_s27 }
 0xfc1   :  { %1538 = vrot.lane.b32.xlu1 %v3070_v33, %s3159_s27 }
0x1032   :  { %v1446_v34 = vpop.permute.xlu0 %1445 }
0x1033   :  { %v1448_v36 = vmul.f32 %v1446_v34, %v1430_v18  ;;  %v1539_v37 = vpop.permute.xlu1 %1538 }
0x1034   :  { %v1541_v40 = vmul.f32 %v1539_v37, %v1523_v20  ;;  %v3102_v37 = vld [vmem:[#allocation2 + $0x68] ss:$0 sm:$0xff] }
0x1035   :  { %1543 = vrot.lane.b32.xlu0 %v1448_v36, %s3160_s28 }
0x1036   :  { %1618 = vrot.lane.b32.xlu1 %v1541_v40, %s3160_s28 }
0x1039   :  { %84 = vperm.xlu0 %3003, %v50_v41  }
0x10a7   :  { %v3477_v42 = vpop.permute.xlu0 %1543 }
0x10a8   :  { %v1619_v43 = vpop.permute.xlu1 %1618  ;;  %2742 = vmatmul.mubr.msk.f32.vlgmr.msra.gmra.mrb[14].mxu0 %vm116_vm1, %v3477_v42 }
0x10a9   :  { %2753 = vmatmul.mubr.msk.f32.vlgmr.msra.gmra.mrb[18].mxu1 %vm116_vm1, %v1619_v43  ;;  %2951 = vmatpush3.bf16.msra.mxu0 %v3203_v6 }
0x10aa   :  { %2952 = vmatprep.subr.bf16.mxu0 %v3155_v0  ;;  %2763 = vmatprep.mubr.msk.f32.mxu0 %vm3156_vm0, %v3157_v1 }
0x10ab   :  { %2957 = vmatpush3.bf16.msra.mxu1 %v3228_v31  ;;  %2774 = vmatprep.mubr.msk.f32.mxu1 %vm3156_vm0, %v3157_v1 }
0x10ac   :  { %2958 = vmatprep.subr.bf16.mxu1 %v3155_v0 }
0x10ad   :  { %2954 = vmatpush3.bf16.msra.mxu0 %v3209_v9 }
0x10ae   :  { %2961 = vmatprep.subr.bf16.mxu0 %v3155_v0 }
0x10af   :  { %2960 = vmatpush3.bf16.msra.mxu1 %v3233_v38 }
0x10b0   :  { %2764 = vmatmul.mubr.msk.f32.vlgmr.msra.gmra.mrb[16].mxu0 %vm116_vm1, %v1619_v43  ;;  %2967 = vmatprep.subr.bf16.mxu1 %v3155_v0 }
0x10b1   :  { %2963 = vmatpush3.bf16.msra.mxu0 %v3230_v35  ;;  %2785 = vmatprep.mubr.msk.f32.mxu0 %vm3156_vm0, %v3157_v1 }
0x10b2   :  { %2964 = vmatprep.subr.bf16.mxu0 %v3155_v0 }
0x10b5   :  { %2966 = vmatpush3.bf16.msra.mxu0 %v3237_v39 }
0x10b6   :  { %2973 = vmatprep.subr.bf16.mxu0 %v3155_v0 }
0x10b8   :  { %v85_v44 = vpop.permute.xlu0 %84 }
0x10b9   :  { %v102_v51 = vmul.f32 %v3217_v11, %v85_v44 }
0x10bb   :  { %v114_v54 = vadd.f32 %v3220_v13, %v102_v51 }
0x117b   :  { %v1613_v45 = vpop.f32.mrb[14].mxu0 }
0x117c   :  { %v1688_v46 = vpop.f32.mrb[18].mxu1  ;;  %v2743_v47 = vpop.f32.mrb[15].mxu0 }
0x117d   :  { %v1689_v48 = vadd.f32 %v1688_v46, %v1613_v45  ;;  %v2754_v49 = vpop.f32.mrb[19].mxu1 }
0x117f   :  { %v1692_v53 = vadd.f32 %v3272_v50, %v1689_v48 }
0x1181   :  { %3071 = vtanh.f32 %v1692_v53  ;;  %v1693_v60 = vmul.f32 0.5, %v1692_v53 }
0x1183   :  { %v1781_v55 = vpop.f32.mrb[16].mxu0 }
0x1184   :  { %v1785_v56 = vadd.f32 %v1781_v55, %v114_v54  ;;  %v2765_v57 = vpop.f32.mrb[17].mxu0 }
0x1186   :  { %3073 = vtanh.f32 %v1785_v56  ;;  %v1786_v61 = vmul.f32 0.5, %v1785_v56 }
0x1187   :  { %3075 = vtanh.f32 %v1693_v60 }
0x1188   :  { %3077 = vtanh.f32 %v1786_v61 }
0x118b   :  { %v3072_v58 = vpop.eup %3071 }
0x118c   :  { %1700 = vrot.lane.b32.xlu1 %v3072_v58, %s3159_s27 }
0x1190   :  { %v3074_v59 = vpop.eup %3073 }
0x1191   :  { %1793 = vrot.lane.b32.xlu0 %v3074_v59, %s3159_s27  ;;  %v3076_v11 = vpop.eup %3075 }
0x1192   :  { %v1695_v63 = vmul.f32 0.5, %v3076_v11  ;;  %v3078_v2 = vpop.eup %3077  ;;  %v2247_v11 = vld [vmem:[%s3612_s2] sm:$0xff] }
0x1193   :  { %v1788_v13 = vmul.f32 0.5, %v3078_v2 }
0x1194   :  { %v1696_v3 = vadd.f32 0.5, %v1695_v63  ;;  %v2248_v63 = vld [vmem:[%s3612_s2 + $0x8] sm:$0xff] }
0x1195   :  { %v1789_v7 = vadd.f32 0.5, %v1788_v13  ;;  %v2985_v2 = vpack.c.bf16 %v2248_v63, %v2247_v11 }
0x1196   :  { %v1698_v12 = vmul.f32 %v1696_v3, %v3464_v27 }
0x1197   :  { %v1791_v17 = vmul.f32 %v1789_v7, %v3466_v30  ;;  %v3101_v30 = vld [vmem:[#allocation2] ss:$0 sm:$0xff] }
0x11fe   :  { %v1701_v4 = vpop.permute.xlu1 %1700 }
0x11ff   :  { %v1703_v5 = vmul.f32 %v1701_v4, %v1696_v3 }
0x1201   :  { %1705 = vrot.lane.b32.xlu1 %v1703_v5, %s3160_s28 }
0x1203   :  { %v1794_v8 = vpop.permute.xlu0 %1793 }
0x1204   :  { %v1796_v10 = vmul.f32 %v1794_v8, %v1789_v7 }
0x1206   :  { %1798 = vrot.lane.b32.xlu0 %v1796_v10, %s3160_s28  ;;  %v2249_v10 = vld [vmem:[%s3612_s2 + $0x10] sm:$0xff] }
0x1273   :  { %v1706_v14 = vpop.permute.xlu1 %1705 }
0x1274   :  { %v3509_v16 = vadd.f32 %v1706_v14, %v1698_v12  ;;  %v2250_v12 = vld [vmem:[%s3612_s2 + $0x18] sm:$0xff] }
0x1275   :  { %v2989_v14 = vpack.c.bf16 %v2250_v12, %v2249_v10 }
0x1276   :  { %3079 = vtanh.f32 %v3509_v16 }
0x1278   :  { %v1799_v18 = vpop.permute.xlu0 %1798 }
0x1279   :  { %v3513_v19 = vadd.f32 %v1799_v18, %v1791_v17 }
0x127b   :  { %3081 = vtanh.f32 %v3513_v19 }
0x1280   :  { %v3080_v20 = vpop.eup %3079 }
0x1281   :  { %1711 = vrot.lane.b32.xlu1 %v3080_v20, %s3159_s27 }
0x1285   :  { %v3082_v21 = vpop.eup %3081 }
0x1286   :  { %1804 = vrot.lane.b32.xlu0 %v3082_v21, %s3159_s27 }
0x12f3   :  { %v1712_v22 = vpop.permute.xlu1 %1711 }
0x12f4   :  { %v1714_v23 = vmul.f32 %v1712_v22, %v1696_v3 }
0x12f6   :  { %1809 = vrot.lane.b32.xlu1 %v1714_v23, %s3160_s28 }
0x12f8   :  { %v1805_v25 = vpop.permute.xlu0 %1804 }
0x12f9   :  { %v1807_v26 = vmul.f32 %v1805_v25, %v1789_v7 }
0x12fa   :  { %89 = vperm.xlu1 %3004, %v51_v24  }
0x12fb   :  { %1884 = vrot.lane.b32.xlu0 %v1807_v26, %s3160_s28 }
0x1368   :  { %v3523_v27 = vpop.permute.xlu1 %1809 }
0x1369   :  { %2775 = vmatmul.mubr.msk.f32.vlgmr.msra.gmra.mrb[20].mxu1 %vm116_vm1, %v3523_v27 }
0x136a   :  { %2969 = vmatpush3.bf16.msra.mxu1 %v3203_v6  ;;  %2796 = vmatprep.mubr.msk.f32.mxu1 %vm3156_vm0, %v3157_v1 }
0x136b   :  { %2970 = vmatprep.subr.bf16.mxu1 %v3155_v0 }
0x136d   :  { %v1885_v29 = vpop.permute.xlu0 %1884 }
0x136e   :  { %2972 = vmatpush3.bf16.msra.mxu1 %v3209_v9  ;;  %2786 = vmatmul.mubr.msk.f32.vlgmr.msra.gmra.mrb[18].mxu0 %vm116_vm1, %v1885_v29 }
0x136f   :  { %2975 = vmatpush3.bf16.msra.mxu0 %v3228_v31  ;;  %2979 = vmatprep.subr.bf16.mxu1 %v3155_v0 }
0x1370   :  { %2976 = vmatprep.subr.bf16.mxu0 %v3155_v0  ;;  %2807 = vmatprep.mubr.msk.f32.mxu0 %vm3156_vm0, %v3157_v1 }
0x1371   :  { %2797 = vmatmul.mubr.msk.f32.vlgmr.msra.gmra.mrb[22].mxu1 %vm116_vm1, %v1885_v29 }
0x1372   :  { %2981 = vmatpush3.bf16.msra.mxu1 %v3230_v35  ;;  %2818 = vmatprep.mubr.msk.f32.mxu1 %vm3156_vm0, %v3157_v1 }
0x1373   :  { %2978 = vmatpush3.bf16.msra.mxu0 %v3233_v38  ;;  %2982 = vmatprep.subr.bf16.mxu1 %v3155_v0 }
0x1374   :  { %2986 = vmatprep.subr.bf16.mxu0 %v2985_v2 }
0x1376   :  { %2984 = vmatpush3.bf16.msra.mxu1 %v3237_v39 }
0x1379   :  { %v90_v6 = vpop.permute.xlu1 %89 }
0x137a   :  { %v103_v32 = vmul.f32 %v3101_v30, %v90_v6 }
0x137c   :  { %v115_v40 = vadd.f32 %v3102_v37, %v103_v32 }
0x143c   :  { %v1879_v9 = vpop.f32.mrb[20].mxu1 }
0x143d   :  { %v2776_v31 = vpop.f32.mrb[21].mxu1 }
0x1441   :  { %v1954_v33 = vpop.f32.mrb[18].mxu0 }
0x1442   :  { %v1955_v34 = vadd.f32 %v1954_v33, %v1879_v9  ;;  %v2787_v36 = vpop.f32.mrb[19].mxu0 }
0x1444   :  { %v1958_v35 = vadd.f32 %v3272_v50, %v1955_v34  ;;  %v2047_v41 = vpop.f32.mrb[22].mxu1 }
0x1445   :  { %v2051_v1 = vadd.f32 %v2047_v41, %v115_v40  ;;  %v2798_v43 = vpop.f32.mrb[23].mxu1 }
0x1446   :  { %3083 = vtanh.f32 %v1958_v35  ;;  %v1959_v39 = vmul.f32 0.5, %v1958_v35 }
0x1447   :  { %3085 = vtanh.f32 %v2051_v1  ;;  %v2052_v44 = vmul.f32 0.5, %v2051_v1 }
0x1448   :  { %3087 = vtanh.f32 %v1959_v39 }
0x1449   :  { %3089 = vtanh.f32 %v2052_v44 }
0x1450   :  { %v3084_v0 = vpop.eup %3083 }
0x1451   :  { %v3086_v38 = vpop.eup %3085  ;;  %1966 = vrot.lane.b32.xlu0 %v3084_v0, %s3159_s27 }
0x1452   :  { %2059 = vrot.lane.b32.xlu1 %v3086_v38, %s3159_s27  ;;  %v3088_v45 = vpop.eup %3087 }
0x1453   :  { %v3090_v46 = vpop.eup %3089  ;;  %v1961_v47 = vmul.f32 0.5, %v3088_v45 }
0x1454   :  { %v2054_v48 = vmul.f32 0.5, %v3090_v46 }
0x1455   :  { %v1962_v50 = vadd.f32 0.5, %v1961_v47 }
0x1456   :  { %v2055_v51 = vadd.f32 0.5, %v2054_v48 }
0x1457   :  { %v1964_v56 = vmul.f32 %v1962_v50, %v3509_v16 }
0x1458   :  { %v2057_v58 = vmul.f32 %v2055_v51, %v3513_v19 }
0x14c3   :  { %v1967_v49 = vpop.permute.xlu0 %1966 }
0x14c4   :  { %v1969_v53 = vmul.f32 %v1967_v49, %v1962_v50  ;;  %v2060_v54 = vpop.permute.xlu1 %2059 }
0x14c5   :  { %v2062_v55 = vmul.f32 %v2060_v54, %v2055_v51 }
0x14c6   :  { %1971 = vrot.lane.b32.xlu0 %v1969_v53, %s3160_s28 }
0x14c7   :  { %2064 = vrot.lane.b32.xlu1 %v2062_v55, %s3160_s28 }
0x1538   :  { %v1972_v57 = vpop.permute.xlu0 %1971 }
0x1539   :  { %v3552_v59 = vadd.f32 %v1972_v57, %v1964_v56  ;;  %v2065_v60 = vpop.permute.xlu1 %2064 }
0x153a   :  { %v2067_v61 = vadd.f32 %v2065_v60, %v2057_v58 }
0x153b   :  { %3091 = vtanh.f32 %v3552_v59 }
0x153c   :  { %3093 = vtanh.f32 %v2067_v61 }
0x1545   :  { %v3092_v3 = vpop.eup %3091 }
0x1546   :  { %v3094_v4 = vpop.eup %3093  ;;  %1977 = vrot.lane.b32.xlu0 %v3092_v3, %s3159_s27 }
0x1547   :  { %2070 = vrot.lane.b32.xlu1 %v3094_v4, %s3159_s27 }
0x15b8   :  { %v1978_v13 = vpop.permute.xlu0 %1977 }
0x15b9   :  { %v1980_v5 = vmul.f32 %v1978_v13, %v1962_v50  ;;  %v2071_v7 = vpop.permute.xlu1 %2070 }
0x15ba   :  { %v2073_v8 = vmul.f32 %v2071_v7, %v2055_v51 }
0x15bb   :  { %2075 = vrot.lane.b32.xlu0 %v1980_v5, %s3160_s28 }
0x15bc   :  { %2150 = vrot.lane.b32.xlu1 %v2073_v8, %s3160_s28 }
0x162d   :  { %v2076_v16 = vpop.permute.xlu0 %2075 }
0x162e   :  { %v2151_v17 = vpop.permute.xlu1 %2150  ;;  %2808 = vmatmul.mubr.msk.f32.vlgmr.msra.gmra.mrb[20].mxu0 %vm116_vm1, %v2076_v16 }
0x162f   :  { %2819 = vmatmul.mubr.msk.f32.vlgmr.msra.gmra.mrb[24].mxu1 %vm116_vm1, %v2151_v17  ;;  %2988 = vmatpush3.bf16.msra.mxu0 %v2985_v2 }
0x1630   :  { %2829 = vmatprep.mubr.msk.f32.mxu0 %vm116_vm1, %v3294_v28  ;;  %2990 = vmatprep.subr.bf16.mxu0 %v2989_v14 }
0x1633   :  { %2992 = vmatpush3.bf16.msra.mxu0 %v2989_v14 }
0x1636   :  { %2830 = vmatmul.mubr.msk.f32.vlgmr.msra.gmra.mrb[22].mxu0 %vm116_vm1, %v3339_v15  ;;  %v3103_v15 = vld [vmem:[#allocation2 + $0x69] ss:$0 sm:$0xff] }
0x1637   :  { %2832 = vmatprep.mubr.msk.f32.mxu0 %vm116_vm1, %v3385_v62  ;;  %v2416_v62 = vld [vmem:[%s3612_s2 + $0x20] ss:$0 sm:$0xff]  ;;  %s3161_s2 = smov [#allocation5]  }
0x1638   :  { %s2379_s26 = sshll.u32 %s3161_s2, 4  ;;  %s2380_s26 = int_to_ptr.vmem [resolvable:$true] %s2379_s26 }
0x1639   :  { %s3126_s29 = scalar_lea.vmem %s2380_s26, 1024  ;;  %p3131_p9 = scmp.lt.s32.totalorder %s2380_s26, %s2380_s26 }
0x163a   :  { %2833 = vmatmul.mubr.msk.f32.gmra.mrb[24].mxu0 %vm116_vm1, %v3431_v52  ;;  %p3127_p8 = scmp.ne.s32.totalorder %s2380_s26, %s3126_s29  ;;  %p3132_p10 = scmp.lt.s32.totalorder %s3126_s29, %s3126_s29 }
0x163b   :  { %2835 = vmatprep.mubr.msk.f32.mxu0 %vm116_vm1, %v3477_v42 }
0x163c   :  { %p3133_p11 = por %p3132_p10, %p3131_p9 }
0x163e   :  { %2836 = vmatmul.mubr.msk.f32.gmra.mrb[26].mxu0 %vm116_vm1, %v3523_v27  ;;  %p3134_p12 = pnand %p3133_p11, %p3127_p8 }
0x163f   :  { %2838 = vmatprep.mubr.msk.f32.mxu0 %vm116_vm1, %v2076_v16 }
0x1701   :  { %v2145_v28 = vpop.f32.mrb[20].mxu0 }
0x1702   :  { %v2220_v18 = vpop.f32.mrb[24].mxu1  ;;  %v2809_v19 = vpop.f32.mrb[21].mxu0 }
0x1703   :  { %v2221_v20 = vadd.f32 %v2220_v18, %v2145_v28  ;;  %v2820_v21 = vpop.f32.mrb[25].mxu1 }
0x1705   :  { %v2224_v22 = vadd.f32 %v3103_v15, %v2221_v20 }
0x1707   :  { %3095 = vtanh.f32 %v2224_v22  ;;  %v2225_v33 = vmul.f32 0.5, %v2224_v22 }
0x1709   :  { %v2831_v52 = vpop.f32.mrb[22].mxu0  ;;  %3097 = vtanh.f32 %v2225_v33 }
0x170a   :  { %v2333_v23 = vadd.f32 %v2831_v52, %v2416_v62  ;;  %v2327_v42 = vpop.f32.mrb[23].mxu0 }
0x170b   :  { %v2328_v24 = vadd.f32 %v2416_v62, %v2327_v42 }
0x170c   :  { %2367 = vst [vmem:[#allocation5 + $0x8] sm:$0xff] %v2333_v23 }
0x170d   :  { %2366 = vst [vmem:[#allocation5] sm:$0xff] %v2328_v24  ;;  %v2834_v25 = vpop.f32.mrb[24].mxu0 }
0x170e   :  { %v2343_v26 = vadd.f32 %v2834_v25, %v2416_v62  ;;  %v2337_v27 = vpop.f32.mrb[25].mxu0 }
0x170f   :  { %v2338_v29 = vadd.f32 %v2416_v62, %v2337_v27 }
0x1710   :  { %2369 = vst [vmem:[#allocation5 + $0x18] sm:$0xff] %v2343_v26 }
0x1711   :  { %v3096_v6 = vpop.eup %3095  ;;  %2368 = vst [vmem:[#allocation5 + $0x10] sm:$0xff] %v2338_v29  ;;  %v2837_v9 = vpop.f32.mrb[26].mxu0 }
0x1712   :  { %v2353_v31 = vadd.f32 %v2837_v9, %v2416_v62  ;;  %v2347_v30 = vpop.f32.mrb[27].mxu0  ;;  %2232 = vrot.lane.b32.xlu0 %v3096_v6, %s3159_s27 }
0x1713   :  { %v2348_v32 = vadd.f32 %v2416_v62, %v2347_v30  ;;  %v3098_v34 = vpop.eup %3097 }
0x1714   :  { %2371 = vst [vmem:[#allocation5 + $0x28] sm:$0xff] %v2353_v31  ;;  %v2227_v36 = vmul.f32 0.5, %v3098_v34 }
0x1715   :  { %2370 = vst [vmem:[#allocation5 + $0x20] sm:$0xff] %v2348_v32 }
0x1716   :  { %v2228_v37 = vadd.f32 0.5, %v2227_v36 }
0x1718   :  { %v2230_v41 = vmul.f32 %v2228_v37, %v3552_v59 }
0x1784   :  { %v2233_v40 = vpop.permute.xlu0 %2232 }
0x1785   :  { %v2235_v35 = vmul.f32 %v2233_v40, %v2228_v37 }
0x1787   :  { %2237 = vrot.lane.b32.xlu1 %v2235_v35, %s3160_s28 }
0x17f9   :  { %v2238_v1 = vpop.permute.xlu1 %2237 }
0x17fa   :  { %v2240_v43 = vadd.f32 %v2238_v1, %v2230_v41 }
0x17fc   :  { %3099 = vtanh.f32 %v2240_v43 }
0x1806   :  { %v3100_v0 = vpop.eup %3099 }
0x1807   :  { %2243 = vrot.lane.b32.xlu0 %v3100_v0, %s3159_s27 }
0x1879   :  { %v2244_v38 = vpop.permute.xlu0 %2243 }
0x187a   :  { %v2246_v39 = vmul.f32 %v2244_v38, %v2228_v37 }
0x187c   :  { %2257 = vrot.lane.b32.xlu1 %v2246_v39, %s3160_s28 }
0x18ee   :  { %v2258_v44 = vpop.permute.xlu1 %2257 }
0x18ef   :  { %2839 = vmatmul.mubr.msk.f32.gmra.mrb[28].mxu0 %vm116_vm1, %v2258_v44 }
0x19c2   :  { %v2840_v45 = vpop.f32.mrb[28].mxu0 }
0x19c3   :  { %v2363_v46 = vadd.f32 %v2840_v45, %v2416_v62  ;;  %v2357_v47 = vpop.f32.mrb[29].mxu0 }
0x19c4   :  { %v2358_v48 = vadd.f32 %v2416_v62, %v2357_v47 }
0x19c5   :  { %2373 = vst [vmem:[#allocation5 + $0x38] sm:$0xff] %v2363_v46 }
0x19c6   :  { %2372 = vst [vmem:[#allocation5 + $0x30] sm:$0xff] %v2358_v48 }
0x19c7   :  { %3137 = shalt.err (!%p3134_p12)
}
0x19c8   :  { %s3138_s30 = scalar_lea.hbm %s3613_s3, 1024 }
0x19c9   :  { %p3139_p13 = scmp.ne.s32.totalorder %s3613_s3, %s3138_s30  ;;  %p3142_p0 = scmp.lt.u32.totalorder %s3138_s30, %s3613_s3 }
0x19cb   :  { %p3144_p1 = pnand %p3142_p0, %p3139_p13 }
0x19cd   :  { %3147 = shalt.err (!%p3144_p1)
}
0x19ce   :  { %2385 = dma.vmem_to_hbm [thread:$0]  %s2380_s26, 1024, %s3613_s3, [#allocation4], %s3153_s22, %s3153_s22, %s3154_s23  }
0x19cf   :  { %3150 = dma.done.wait [#allocation4], 1024  }
0x19d0   :  { %3151 = vsyncadd [#allocation4], 4294966272 }
0x19d1   :  { %2389 = vsyncpa [#allocation3], 1 }
0x19d2   :  { %2390 = vsyncpa [#allocation4], 1 }

</bundles_post_ra>
